<compile_context>
chip_gen: v5e
topology: v5e:2x2
jax: 0.10.0
libtpu: 0.0.40
codegen_flags: <defaults>
</compile_context>

<pallas_src>
import functools
import math

import numpy as np

import jax
import jax.numpy as jnp
from jax import lax
from jax.experimental import pallas as pl
from jax.experimental.pallas import tpu as pltpu


# ----------------------- backbone geometry constants (Engh-Huber-ish) --------
R_N_CA, R_CA_C, R_C_N = 1.458, 1.523, 1.329            # bond lengths (Angstrom)
A_N_CA_C, A_CA_C_N, A_C_N_CA = 1.9391, 2.0280, 2.1240  # bond angles (rad)

_ONE_TO_THREE = {
    'A': 'ALA', 'R': 'ARG', 'N': 'ASN', 'D': 'ASP', 'C': 'CYS', 'Q': 'GLN',
    'E': 'GLU', 'G': 'GLY', 'H': 'HIS', 'I': 'ILE', 'L': 'LEU', 'K': 'LYS',
    'M': 'MET', 'F': 'PHE', 'P': 'PRO', 'S': 'SER', 'T': 'THR', 'W': 'TRP',
    'Y': 'TYR', 'V': 'VAL',
}

_BATCH_TILE = 8   # batch rows per grid step (one sublane tile)
_LANE = 128       # lane width


# ------------------------------- Pallas kernel --------------------------------
def _scan_kernel(dih_ref, geom_ref, out_ref, *, n_levels):
    """Log-depth associative scan of NeRF affine transforms.

    dih_ref  : (TB, Kp) f32  per-atom dihedral (batch rows x atoms-on-lanes)
    geom_ref : (3,  Kp) f32  rows = [cos(theta_k), sin(theta_k), bond_len_k]
    out_ref  : (3, TB, Kp) f32  xyz of every atom for every batch row
    """
    dih = dih_ref[...]                                    # (TB, Kp)
    geom = geom_ref[...]                                  # (3, Kp)
    shape = dih.shape

    # Batch-invariant geometry, broadcast once (hoisted, not per-level).
    ct = jnp.broadcast_to(geom[0:1, :], shape)
    st = jnp.broadcast_to(geom[1:2, :], shape)
    dl = jnp.broadcast_to(geom[2:3, :], shape)

    # Vectorized prologue: every local transform A_k = [[R_k, v_k]] at once.
    c = jnp.cos(dih)
    s = jnp.sin(dih)
    zero = jnp.zeros(shape, jnp.float32)

    r00 = ct
    r01 = -st
    r02 = zero
    r10 = c * st
    r11 = c * ct
    r12 = -s
    r20 = s * st
    r21 = s * ct
    r22 = c
    t0 = dl * ct
    t1 = dl * r10
    t2 = dl * r20

    chans = [r00, r01, r02, r10, r11, r12, r20, r21, r22, t0, t1, t2]
    idents = (1.0, 0.0, 0.0,
              0.0, 1.0, 0.0,
              0.0, 0.0, 1.0,
              0.0, 0.0, 0.0)

    lane = lax.broadcasted_iota(jnp.int32, shape, 1)

    # Hillis-Steele inclusive scan:  y[k] <- y[k-d] o y[k]
    # where (Z o Y): R = Rz @ Ry,  t = Rz @ ty + tz   (Z is the *earlier* span).
    shift = 1
    for _ in range(n_levels):
        keep = lane >= shift
        z = [jnp.where(keep, pltpu.roll(ch, shift=shift, axis=1),
                       jnp.float32(iv))
             for ch, iv in zip(chans, idents)]
        z00, z01, z02, z10, z11, z12, z20, z21, z22, w0, w1, w2 = z
        y00, y01, y02, y10, y11, y12, y20, y21, y22, u0, u1, u2 = chans
        chans = [
            z00 * y00 + z01 * y10 + z02 * y20,
            z00 * y01 + z01 * y11 + z02 * y21,
            z00 * y02 + z01 * y12 + z02 * y22,
            z10 * y00 + z11 * y10 + z12 * y20,
            z10 * y01 + z11 * y11 + z12 * y21,
            z10 * y02 + z11 * y12 + z12 * y22,
            z20 * y00 + z21 * y10 + z22 * y20,
            z20 * y01 + z21 * y11 + z22 * y21,
            z20 * y02 + z21 * y12 + z22 * y22,
            z00 * u0 + z01 * u1 + z02 * u2 + w0,
            z10 * u0 + z11 * u1 + z12 * u2 + w1,
            z20 * u0 + z21 * u1 + z22 * u2 + w2,
        ]
        shift *= 2

    # Direct full-tile stores (no concatenate, no masked partial stores).
    out_ref[0] = chans[9]
    out_ref[1] = chans[10]
    out_ref[2] = chans[11]


def _build_coords(dih_bk, geom_3k, k_real):
    """dih_bk: (Bp, Kp) f32, geom_3k: (3, Kp) f32 -> (3, Bp, Kp) f32 coords."""
    Bp, Kp = dih_bk.shape
    n_levels = max(1, int(math.ceil(math.log2(max(int(k_real), 2)))))
    kernel = functools.partial(_scan_kernel, n_levels=n_levels)
    return pl.pallas_call(
        kernel,
        out_shape=jax.ShapeDtypeStruct((3, Bp, Kp), jnp.float32),
        grid_spec=pltpu.PrefetchScalarGridSpec(
            num_scalar_prefetch=0,
            grid=(Bp // _BATCH_TILE,),
            in_specs=[
                pl.BlockSpec((_BATCH_TILE, Kp), lambda i: (i, 0)),
                pl.BlockSpec((3, Kp), lambda i: (0, 0)),
            ],
            out_specs=pl.BlockSpec((3, _BATCH_TILE, Kp), lambda i: (0, i, 0)),
        ),
        compiler_params=pltpu.CompilerParams(
            dimension_semantics=("parallel",)),
    )(dih_bk, geom_3k)


# --------------------------------- wrapper ------------------------------------
def angles2coords_forward(input_angles, sequences):
    """JAX/Pallas analogue of Angles2Coords.forward.

    input_angles: (B, 7, L) float — channels [phi, psi, omega, chi1..chi4]
    sequences:    list of B one-letter amino-acid strings (len(seq) <= L)
    returns (coords (B, 3*max_atoms) float32,
             resnames (B, max_atoms, 4) uint8,
             atomnames (B, max_atoms, 4) uint8,
             num_atoms (B,) int32)
    """
    B, n_ang, L = input_angles.shape
    assert n_ang >= 3
    # TODO(synk): only backbone N/CA/C atoms are generated (3 per residue);
    # the C++ library's per-residue side-chain construction has no clean Pallas analogue.
    num_atoms_np = np.array([3 * len(s) for s in sequences], dtype=np.int32)
    max_atoms = int(num_atoms_np.max())
    K = 3 * L
    Kp = max(_LANE, -(-K // _LANE) * _LANE)          # atoms padded to lane multiple
    Bp = -(-B // _BATCH_TILE) * _BATCH_TILE          # batch padded to sublane tile

    angles32 = jnp.asarray(input_angles, jnp.float32)
    phi = angles32[:, 0, :]
    psi = angles32[:, 1, :]
    omg = angles32[:, 2, :]
    zcol = jnp.zeros((B, 1), jnp.float32)
    psi_prev = jnp.concatenate([zcol, psi[:, :-1]], axis=1)
    omg_prev = jnp.concatenate([zcol, omg[:, :-1]], axis=1)
    # per-atom dihedral, atom order (N_i, CA_i, C_i):
    #   N_i <- psi_{i-1},  CA_i <- omega_{i-1},  C_i <- phi_i
    dih = jnp.stack([psi_prev, omg_prev, phi], axis=2).reshape(B, K)      # (B, K)
    dih = jnp.pad(dih, ((0, Bp - B), (0, Kp - K)))                        # (Bp, Kp)

    # Static per-atom bond geometry (batch-invariant, tiny).  Padding atoms get
    # theta=0, d=0 -> identity transforms (they never feed real outputs anyway).
    theta = np.zeros(Kp, np.float32)
    dlen = np.zeros(Kp, np.float32)
    for i in range(L):
        theta[3 * i] = 0.0 if i == 0 else math.pi - A_CA_C_N      # N_i
        dlen[3 * i] = 0.0 if i == 0 else R_C_N
        theta[3 * i + 1] = 0.0 if i == 0 else math.pi - A_C_N_CA  # CA_i
        dlen[3 * i + 1] = R_N_CA
        theta[3 * i + 2] = math.pi - A_N_CA_C                     # C_i
        dlen[3 * i + 2] = R_CA_C
    geom = jnp.asarray(
        np.stack([np.cos(theta), np.sin(theta), dlen]).astype(np.float32))  # (3, Kp)

    coords_3bk = _build_coords(dih, geom, K)                      # (3, Bp, Kp) f32

    # Note: no eager isnan() host sync here (it serializes dispatch); callers
    # can check jnp.isfinite lazily if they need the reference's NaN guard.
    coords = jnp.transpose(coords_3bk[:, :B, :K], (1, 2, 0)).reshape(B, 3 * K)
    coords = coords[:, :3 * max_atoms]

    # Zero the padding atoms (output buffer is torch.zeros in the reference).
    atom_mask = (np.arange(max_atoms)[None, :] < num_atoms_np[:, None])
    mask3 = jnp.asarray(np.repeat(atom_mask, 3, axis=1).astype(np.float32))
    coords = coords * mask3     # float32 (TPU has no native f64 vector math)

    # Residue / atom name tensors (string handling = host-side glue).
    resnames_np = np.zeros((B, max_atoms, 4), np.uint8)
    atomnames_np = np.zeros((B, max_atoms, 4), np.uint8)
    bb_names = ["N", "CA", "C"]
    for b, seq in enumerate(sequences):
        for a in range(3 * len(seq)):
            res3 = _ONE_TO_THREE.get(seq[a // 3].upper(), "UNK") + "\x00"
            an = bb_names[a % 3] + "\x00"
            rb = np.frombuffer(res3.encode(), np.uint8)
            ab = np.frombuffer(an.encode(), np.uint8)
            resnames_np[b, a, :rb.shape[0]] = rb
            atomnames_np[b, a, :ab.shape[0]] = ab

    return (coords,
            jnp.asarray(resnames_np),
            jnp.asarray(atomnames_np),
            jnp.asarray(num_atoms_np))


if __name__ == "__main__":
    key = jax.random.PRNGKey(0)
    B, L = 2, 8
    sequences = ["ACDEFGHI", "KLMNPQRS"]
    angles = jax.random.uniform(key, (B, 7, L), dtype=jnp.float32,
                                minval=-math.pi, maxval=math.pi)

    coords, resnames, atomnames, num_atoms = angles2coords_forward(angles, sequences)
    jax.block_until_ready(coords)

    assert coords.shape == (B, 3 * 3 * L) and coords.dtype == jnp.float32
    assert resnames.shape == (B, 3 * L, 4) and resnames.dtype == jnp.uint8
    assert atomnames.shape == (B, 3 * L, 4) and atomnames.dtype == jnp.uint8
    assert num_atoms.shape == (B,) and num_atoms.dtype == jnp.int32
    assert bool(jnp.isfinite(coords).all())

    # Geometric sanity: N(0)->CA(0) bond length must equal R_N_CA.
    cnp = np.asarray(coords)
    d01 = np.linalg.norm(cnp[:, 3:6] - cnp[:, 0:3], axis=1)
    assert np.allclose(d01, R_N_CA, atol=1e-3), d01
    d12 = np.linalg.norm(cnp[:, 6:9] - cnp[:, 3:6], axis=1)
    assert np.allclose(d12, R_CA_C, atol=1e-3), d12

    print("KERNEL_OK")
</pallas_src>

<mosaic_0001>
module attributes {stable_mosaic.version = 11 : i64} {
  func.func @_scan_kernel(%arg0: i32, %arg1: memref<8x128xf32, #tpu.memory_space<vmem>>, %arg2: memref<3x128xf32, #tpu.memory_space<vmem>>, %arg3: memref<3x8x128xf32, #tpu.memory_space<vmem>>) attributes {dimension_semantics = [#tpu.dimension_semantics<parallel>], iteration_bounds = array<i64: 1>, scalar_prefetch = 0 : i64, scratch_operands = 0 : i64, tpu.core_type = #tpu.core_type<tc>, window_params = [{transform_indices = @transform_0, window_bounds = array<i64: 8, 128>}, {pipeline_mode = #tpu.pipeline_mode<synchronous>, transform_indices = @transform_1, window_bounds = array<i64: 3, 128>}, {transform_indices = @transform_2, window_bounds = array<i64: 3, 8, 128>}]} {
    %c0 = arith.constant 0 : index
    %c0_0 = arith.constant 0 : index
    %0 = vector.load %arg1[%c0, %c0_0] : memref<8x128xf32, #tpu.memory_space<vmem>>, vector<8x128xf32>
    %c0_1 = arith.constant 0 : index
    %c0_2 = arith.constant 0 : index
    %1 = vector.load %arg2[%c0_1, %c0_2] : memref<3x128xf32, #tpu.memory_space<vmem>>, vector<3x128xf32>
    %2 = vector.extract_strided_slice %1 {offsets = [0, 0], sizes = [1, 128], strides = [1, 1]} : vector<3x128xf32> to vector<1x128xf32>
    %3 = vector.shape_cast %2 : vector<1x128xf32> to vector<1x128xf32>
    %4 = vector.broadcast %3 : vector<1x128xf32> to vector<8x128xf32>
    %5 = vector.extract_strided_slice %1 {offsets = [1, 0], sizes = [1, 128], strides = [1, 1]} : vector<3x128xf32> to vector<1x128xf32>
    %6 = vector.shape_cast %5 : vector<1x128xf32> to vector<1x128xf32>
    %7 = vector.broadcast %6 : vector<1x128xf32> to vector<8x128xf32>
    %8 = vector.extract_strided_slice %1 {offsets = [2, 0], sizes = [1, 128], strides = [1, 1]} : vector<3x128xf32> to vector<1x128xf32>
    %9 = vector.shape_cast %8 : vector<1x128xf32> to vector<1x128xf32>
    %10 = vector.broadcast %9 : vector<1x128xf32> to vector<8x128xf32>
    %11 = math.cos %0 : vector<8x128xf32>
    %12 = math.sin %0 : vector<8x128xf32>
    %cst = arith.constant 0.000000e+00 : f32
    %13 = vector.broadcast %cst : f32 to vector<8x128xf32>
    %cst_3 = arith.constant 0.000000e+00 : f32
    %14 = vector.broadcast %cst_3 : f32 to vector<8x128xf32>
    %15 = arith.subf %14, %7 : vector<8x128xf32>
    %16 = arith.mulf %11, %7 : vector<8x128xf32>
    %17 = arith.mulf %11, %4 : vector<8x128xf32>
    %cst_4 = arith.constant 0.000000e+00 : f32
    %18 = vector.broadcast %cst_4 : f32 to vector<8x128xf32>
    %19 = arith.subf %18, %12 : vector<8x128xf32>
    %20 = arith.mulf %12, %7 : vector<8x128xf32>
    %21 = arith.mulf %12, %4 : vector<8x128xf32>
    %22 = arith.mulf %10, %4 : vector<8x128xf32>
    %23 = arith.mulf %10, %16 : vector<8x128xf32>
    %24 = arith.mulf %10, %20 : vector<8x128xf32>
    %25 = tpu.iota {dimensions = array<i32: 1>} : vector<8x128xi32>
    %c1_i32 = arith.constant 1 : i32
    %26 = vector.broadcast %c1_i32 : i32 to vector<8x128xi32>
    %27 = arith.cmpi sge, %25, %26 : vector<8x128xi32>
    %c1_i32_5 = arith.constant 1 : i32
    %28 = tpu.dynamic_rotate %4 by %c1_i32_5 dim 1 : vector<8x128xf32>, i32 -> vector<8x128xf32>
    %cst_6 = arith.constant 1.000000e+00 : f32
    %29 = vector.broadcast %cst_6 : f32 to vector<8x128xf32>
    %30 = arith.select %27, %28, %29 : vector<8x128xi1>, vector<8x128xf32>
    %c1_i32_7 = arith.constant 1 : i32
    %31 = tpu.dynamic_rotate %15 by %c1_i32_7 dim 1 : vector<8x128xf32>, i32 -> vector<8x128xf32>
    %cst_8 = arith.constant 0.000000e+00 : f32
    %32 = vector.broadcast %cst_8 : f32 to vector<8x128xf32>
    %33 = arith.select %27, %31, %32 : vector<8x128xi1>, vector<8x128xf32>
    %c1_i32_9 = arith.constant 1 : i32
    %34 = tpu.dynamic_rotate %13 by %c1_i32_9 dim 1 : vector<8x128xf32>, i32 -> vector<8x128xf32>
    %cst_10 = arith.constant 0.000000e+00 : f32
    %35 = vector.broadcast %cst_10 : f32 to vector<8x128xf32>
    %36 = arith.select %27, %34, %35 : vector<8x128xi1>, vector<8x128xf32>
    %c1_i32_11 = arith.constant 1 : i32
    %37 = tpu.dynamic_rotate %16 by %c1_i32_11 dim 1 : vector<8x128xf32>, i32 -> vector<8x128xf32>
    %cst_12 = arith.constant 0.000000e+00 : f32
    %38 = vector.broadcast %cst_12 : f32 to vector<8x128xf32>
    %39 = arith.select %27, %37, %38 : vector<8x128xi1>, vector<8x128xf32>
    %c1_i32_13 = arith.constant 1 : i32
    %40 = tpu.dynamic_rotate %17 by %c1_i32_13 dim 1 : vector<8x128xf32>, i32 -> vector<8x128xf32>
    %cst_14 = arith.constant 1.000000e+00 : f32
    %41 = vector.broadcast %cst_14 : f32 to vector<8x128xf32>
    %42 = arith.select %27, %40, %41 : vector<8x128xi1>, vector<8x128xf32>
    %c1_i32_15 = arith.constant 1 : i32
    %43 = tpu.dynamic_rotate %19 by %c1_i32_15 dim 1 : vector<8x128xf32>, i32 -> vector<8x128xf32>
    %cst_16 = arith.constant 0.000000e+00 : f32
    %44 = vector.broadcast %cst_16 : f32 to vector<8x128xf32>
    %45 = arith.select %27, %43, %44 : vector<8x128xi1>, vector<8x128xf32>
    %c1_i32_17 = arith.constant 1 : i32
    %46 = tpu.dynamic_rotate %20 by %c1_i32_17 dim 1 : vector<8x128xf32>, i32 -> vector<8x128xf32>
    %cst_18 = arith.constant 0.000000e+00 : f32
    %47 = vector.broadcast %cst_18 : f32 to vector<8x128xf32>
    %48 = arith.select %27, %46, %47 : vector<8x128xi1>, vector<8x128xf32>
    %c1_i32_19 = arith.constant 1 : i32
    %49 = tpu.dynamic_rotate %21 by %c1_i32_19 dim 1 : vector<8x128xf32>, i32 -> vector<8x128xf32>
    %cst_20 = arith.constant 0.000000e+00 : f32
    %50 = vector.broadcast %cst_20 : f32 to vector<8x128xf32>
    %51 = arith.select %27, %49, %50 : vector<8x128xi1>, vector<8x128xf32>
    %c1_i32_21 = arith.constant 1 : i32
    %52 = tpu.dynamic_rotate %11 by %c1_i32_21 dim 1 : vector<8x128xf32>, i32 -> vector<8x128xf32>
    %cst_22 = arith.constant 1.000000e+00 : f32
    %53 = vector.broadcast %cst_22 : f32 to vector<8x128xf32>
    %54 = arith.select %27, %52, %53 : vector<8x128xi1>, vector<8x128xf32>
    %c1_i32_23 = arith.constant 1 : i32
    %55 = tpu.dynamic_rotate %22 by %c1_i32_23 dim 1 : vector<8x128xf32>, i32 -> vector<8x128xf32>
    %cst_24 = arith.constant 0.000000e+00 : f32
    %56 = vector.broadcast %cst_24 : f32 to vector<8x128xf32>
    %57 = arith.select %27, %55, %56 : vector<8x128xi1>, vector<8x128xf32>
    %c1_i32_25 = arith.constant 1 : i32
    %58 = tpu.dynamic_rotate %23 by %c1_i32_25 dim 1 : vector<8x128xf32>, i32 -> vector<8x128xf32>
    %cst_26 = arith.constant 0.000000e+00 : f32
    %59 = vector.broadcast %cst_26 : f32 to vector<8x128xf32>
    %60 = arith.select %27, %58, %59 : vector<8x128xi1>, vector<8x128xf32>
    %c1_i32_27 = arith.constant 1 : i32
    %61 = tpu.dynamic_rotate %24 by %c1_i32_27 dim 1 : vector<8x128xf32>, i32 -> vector<8x128xf32>
    %cst_28 = arith.constant 0.000000e+00 : f32
    %62 = vector.broadcast %cst_28 : f32 to vector<8x128xf32>
    %63 = arith.select %27, %61, %62 : vector<8x128xi1>, vector<8x128xf32>
    %64 = arith.mulf %30, %4 : vector<8x128xf32>
    %65 = arith.mulf %33, %16 : vector<8x128xf32>
    %66 = arith.addf %64, %65 : vector<8x128xf32>
    %67 = arith.mulf %36, %20 : vector<8x128xf32>
    %68 = arith.addf %66, %67 : vector<8x128xf32>
    %69 = arith.mulf %30, %15 : vector<8x128xf32>
    %70 = arith.mulf %33, %17 : vector<8x128xf32>
    %71 = arith.addf %69, %70 : vector<8x128xf32>
    %72 = arith.mulf %36, %21 : vector<8x128xf32>
    %73 = arith.addf %71, %72 : vector<8x128xf32>
    %74 = arith.mulf %30, %13 : vector<8x128xf32>
    %75 = arith.mulf %33, %19 : vector<8x128xf32>
    %76 = arith.addf %74, %75 : vector<8x128xf32>
    %77 = arith.mulf %36, %11 : vector<8x128xf32>
    %78 = arith.addf %76, %77 : vector<8x128xf32>
    %79 = arith.mulf %39, %4 : vector<8x128xf32>
    %80 = arith.mulf %42, %16 : vector<8x128xf32>
    %81 = arith.addf %79, %80 : vector<8x128xf32>
    %82 = arith.mulf %45, %20 : vector<8x128xf32>
    %83 = arith.addf %81, %82 : vector<8x128xf32>
    %84 = arith.mulf %39, %15 : vector<8x128xf32>
    %85 = arith.mulf %42, %17 : vector<8x128xf32>
    %86 = arith.addf %84, %85 : vector<8x128xf32>
    %87 = arith.mulf %45, %21 : vector<8x128xf32>
    %88 = arith.addf %86, %87 : vector<8x128xf32>
    %89 = arith.mulf %39, %13 : vector<8x128xf32>
    %90 = arith.mulf %42, %19 : vector<8x128xf32>
    %91 = arith.addf %89, %90 : vector<8x128xf32>
    %92 = arith.mulf %45, %11 : vector<8x128xf32>
    %93 = arith.addf %91, %92 : vector<8x128xf32>
    %94 = arith.mulf %48, %4 : vector<8x128xf32>
    %95 = arith.mulf %51, %16 : vector<8x128xf32>
    %96 = arith.addf %94, %95 : vector<8x128xf32>
    %97 = arith.mulf %54, %20 : vector<8x128xf32>
    %98 = arith.addf %96, %97 : vector<8x128xf32>
    %99 = arith.mulf %48, %15 : vector<8x128xf32>
    %100 = arith.mulf %51, %17 : vector<8x128xf32>
    %101 = arith.addf %99, %100 : vector<8x128xf32>
    %102 = arith.mulf %54, %21 : vector<8x128xf32>
    %103 = arith.addf %101, %102 : vector<8x128xf32>
    %104 = arith.mulf %48, %13 : vector<8x128xf32>
    %105 = arith.mulf %51, %19 : vector<8x128xf32>
    %106 = arith.addf %104, %105 : vector<8x128xf32>
    %107 = arith.mulf %54, %11 : vector<8x128xf32>
    %108 = arith.addf %106, %107 : vector<8x128xf32>
    %109 = arith.mulf %30, %22 : vector<8x128xf32>
    %110 = arith.mulf %33, %23 : vector<8x128xf32>
    %111 = arith.addf %109, %110 : vector<8x128xf32>
    %112 = arith.mulf %36, %24 : vector<8x128xf32>
    %113 = arith.addf %111, %112 : vector<8x128xf32>
    %114 = arith.addf %113, %57 : vector<8x128xf32>
    %115 = arith.mulf %39, %22 : vector<8x128xf32>
    %116 = arith.mulf %42, %23 : vector<8x128xf32>
    %117 = arith.addf %115, %116 : vector<8x128xf32>
    %118 = arith.mulf %45, %24 : vector<8x128xf32>
    %119 = arith.addf %117, %118 : vector<8x128xf32>
    %120 = arith.addf %119, %60 : vector<8x128xf32>
    %121 = arith.mulf %48, %22 : vector<8x128xf32>
    %122 = arith.mulf %51, %23 : vector<8x128xf32>
    %123 = arith.addf %121, %122 : vector<8x128xf32>
    %124 = arith.mulf %54, %24 : vector<8x128xf32>
    %125 = arith.addf %123, %124 : vector<8x128xf32>
    %126 = arith.addf %125, %63 : vector<8x128xf32>
    %c2_i32 = arith.constant 2 : i32
    %127 = vector.broadcast %c2_i32 : i32 to vector<8x128xi32>
    %128 = arith.cmpi sge, %25, %127 : vector<8x128xi32>
    %c2_i32_29 = arith.constant 2 : i32
    %129 = tpu.dynamic_rotate %68 by %c2_i32_29 dim 1 : vector<8x128xf32>, i32 -> vector<8x128xf32>
    %cst_30 = arith.constant 1.000000e+00 : f32
    %130 = vector.broadcast %cst_30 : f32 to vector<8x128xf32>
    %131 = arith.select %128, %129, %130 : vector<8x128xi1>, vector<8x128xf32>
    %c2_i32_31 = arith.constant 2 : i32
    %132 = tpu.dynamic_rotate %73 by %c2_i32_31 dim 1 : vector<8x128xf32>, i32 -> vector<8x128xf32>
    %cst_32 = arith.constant 0.000000e+00 : f32
    %133 = vector.broadcast %cst_32 : f32 to vector<8x128xf32>
    %134 = arith.select %128, %132, %133 : vector<8x128xi1>, vector<8x128xf32>
    %c2_i32_33 = arith.constant 2 : i32
    %135 = tpu.dynamic_rotate %78 by %c2_i32_33 dim 1 : vector<8x128xf32>, i32 -> vector<8x128xf32>
    %cst_34 = arith.constant 0.000000e+00 : f32
    %136 = vector.broadcast %cst_34 : f32 to vector<8x128xf32>
    %137 = arith.select %128, %135, %136 : vector<8x128xi1>, vector<8x128xf32>
    %c2_i32_35 = arith.constant 2 : i32
    %138 = tpu.dynamic_rotate %83 by %c2_i32_35 dim 1 : vector<8x128xf32>, i32 -> vector<8x128xf32>
    %cst_36 = arith.constant 0.000000e+00 : f32
    %139 = vector.broadcast %cst_36 : f32 to vector<8x128xf32>
    %140 = arith.select %128, %138, %139 : vector<8x128xi1>, vector<8x128xf32>
    %c2_i32_37 = arith.constant 2 : i32
    %141 = tpu.dynamic_rotate %88 by %c2_i32_37 dim 1 : vector<8x128xf32>, i32 -> vector<8x128xf32>
    %cst_38 = arith.constant 1.000000e+00 : f32
    %142 = vector.broadcast %cst_38 : f32 to vector<8x128xf32>
    %143 = arith.select %128, %141, %142 : vector<8x128xi1>, vector<8x128xf32>
    %c2_i32_39 = arith.constant 2 : i32
    %144 = tpu.dynamic_rotate %93 by %c2_i32_39 dim 1 : vector<8x128xf32>, i32 -> vector<8x128xf32>
    %cst_40 = arith.constant 0.000000e+00 : f32
    %145 = vector.broadcast %cst_40 : f32 to vector<8x128xf32>
    %146 = arith.select %128, %144, %145 : vector<8x128xi1>, vector<8x128xf32>
    %c2_i32_41 = arith.constant 2 : i32
    %147 = tpu.dynamic_rotate %98 by %c2_i32_41 dim 1 : vector<8x128xf32>, i32 -> vector<8x128xf32>
    %cst_42 = arith.constant 0.000000e+00 : f32
    %148 = vector.broadcast %cst_42 : f32 to vector<8x128xf32>
    %149 = arith.select %128, %147, %148 : vector<8x128xi1>, vector<8x128xf32>
    %c2_i32_43 = arith.constant 2 : i32
    %150 = tpu.dynamic_rotate %103 by %c2_i32_43 dim 1 : vector<8x128xf32>, i32 -> vector<8x128xf32>
    %cst_44 = arith.constant 0.000000e+00 : f32
    %151 = vector.broadcast %cst_44 : f32 to vector<8x128xf32>
    %152 = arith.select %128, %150, %151 : vector<8x128xi1>, vector<8x128xf32>
    %c2_i32_45 = arith.constant 2 : i32
    %153 = tpu.dynamic_rotate %108 by %c2_i32_45 dim 1 : vector<8x128xf32>, i32 -> vector<8x128xf32>
    %cst_46 = arith.constant 1.000000e+00 : f32
    %154 = vector.broadcast %cst_46 : f32 to vector<8x128xf32>
    %155 = arith.select %128, %153, %154 : vector<8x128xi1>, vector<8x128xf32>
    %c2_i32_47 = arith.constant 2 : i32
    %156 = tpu.dynamic_rotate %114 by %c2_i32_47 dim 1 : vector<8x128xf32>, i32 -> vector<8x128xf32>
    %cst_48 = arith.constant 0.000000e+00 : f32
    %157 = vector.broadcast %cst_48 : f32 to vector<8x128xf32>
    %158 = arith.select %128, %156, %157 : vector<8x128xi1>, vector<8x128xf32>
    %c2_i32_49 = arith.constant 2 : i32
    %159 = tpu.dynamic_rotate %120 by %c2_i32_49 dim 1 : vector<8x128xf32>, i32 -> vector<8x128xf32>
    %cst_50 = arith.constant 0.000000e+00 : f32
    %160 = vector.broadcast %cst_50 : f32 to vector<8x128xf32>
    %161 = arith.select %128, %159, %160 : vector<8x128xi1>, vector<8x128xf32>
    %c2_i32_51 = arith.constant 2 : i32
    %162 = tpu.dynamic_rotate %126 by %c2_i32_51 dim 1 : vector<8x128xf32>, i32 -> vector<8x128xf32>
    %cst_52 = arith.constant 0.000000e+00 : f32
    %163 = vector.broadcast %cst_52 : f32 to vector<8x128xf32>
    %164 = arith.select %128, %162, %163 : vector<8x128xi1>, vector<8x128xf32>
    %165 = arith.mulf %131, %68 : vector<8x128xf32>
    %166 = arith.mulf %134, %83 : vector<8x128xf32>
    %167 = arith.addf %165, %166 : vector<8x128xf32>
    %168 = arith.mulf %137, %98 : vector<8x128xf32>
    %169 = arith.addf %167, %168 : vector<8x128xf32>
    %170 = arith.mulf %131, %73 : vector<8x128xf32>
    %171 = arith.mulf %134, %88 : vector<8x128xf32>
    %172 = arith.addf %170, %171 : vector<8x128xf32>
    %173 = arith.mulf %137, %103 : vector<8x128xf32>
    %174 = arith.addf %172, %173 : vector<8x128xf32>
    %175 = arith.mulf %131, %78 : vector<8x128xf32>
    %176 = arith.mulf %134, %93 : vector<8x128xf32>
    %177 = arith.addf %175, %176 : vector<8x128xf32>
    %178 = arith.mulf %137, %108 : vector<8x128xf32>
    %179 = arith.addf %177, %178 : vector<8x128xf32>
    %180 = arith.mulf %140, %68 : vector<8x128xf32>
    %181 = arith.mulf %143, %83 : vector<8x128xf32>
    %182 = arith.addf %180, %181 : vector<8x128xf32>
    %183 = arith.mulf %146, %98 : vector<8x128xf32>
    %184 = arith.addf %182, %183 : vector<8x128xf32>
    %185 = arith.mulf %140, %73 : vector<8x128xf32>
    %186 = arith.mulf %143, %88 : vector<8x128xf32>
    %187 = arith.addf %185, %186 : vector<8x128xf32>
    %188 = arith.mulf %146, %103 : vector<8x128xf32>
    %189 = arith.addf %187, %188 : vector<8x128xf32>
    %190 = arith.mulf %140, %78 : vector<8x128xf32>
    %191 = arith.mulf %143, %93 : vector<8x128xf32>
    %192 = arith.addf %190, %191 : vector<8x128xf32>
    %193 = arith.mulf %146, %108 : vector<8x128xf32>
    %194 = arith.addf %192, %193 : vector<8x128xf32>
    %195 = arith.mulf %149, %68 : vector<8x128xf32>
    %196 = arith.mulf %152, %83 : vector<8x128xf32>
    %197 = arith.addf %195, %196 : vector<8x128xf32>
    %198 = arith.mulf %155, %98 : vector<8x128xf32>
    %199 = arith.addf %197, %198 : vector<8x128xf32>
    %200 = arith.mulf %149, %73 : vector<8x128xf32>
    %201 = arith.mulf %152, %88 : vector<8x128xf32>
    %202 = arith.addf %200, %201 : vector<8x128xf32>
    %203 = arith.mulf %155, %103 : vector<8x128xf32>
    %204 = arith.addf %202, %203 : vector<8x128xf32>
    %205 = arith.mulf %149, %78 : vector<8x128xf32>
    %206 = arith.mulf %152, %93 : vector<8x128xf32>
    %207 = arith.addf %205, %206 : vector<8x128xf32>
    %208 = arith.mulf %155, %108 : vector<8x128xf32>
    %209 = arith.addf %207, %208 : vector<8x128xf32>
    %210 = arith.mulf %131, %114 : vector<8x128xf32>
    %211 = arith.mulf %134, %120 : vector<8x128xf32>
    %212 = arith.addf %210, %211 : vector<8x128xf32>
    %213 = arith.mulf %137, %126 : vector<8x128xf32>
    %214 = arith.addf %212, %213 : vector<8x128xf32>
    %215 = arith.addf %214, %158 : vector<8x128xf32>
    %216 = arith.mulf %140, %114 : vector<8x128xf32>
    %217 = arith.mulf %143, %120 : vector<8x128xf32>
    %218 = arith.addf %216, %217 : vector<8x128xf32>
    %219 = arith.mulf %146, %126 : vector<8x128xf32>
    %220 = arith.addf %218, %219 : vector<8x128xf32>
    %221 = arith.addf %220, %161 : vector<8x128xf32>
    %222 = arith.mulf %149, %114 : vector<8x128xf32>
    %223 = arith.mulf %152, %120 : vector<8x128xf32>
    %224 = arith.addf %222, %223 : vector<8x128xf32>
    %225 = arith.mulf %155, %126 : vector<8x128xf32>
    %226 = arith.addf %224, %225 : vector<8x128xf32>
    %227 = arith.addf %226, %164 : vector<8x128xf32>
    %c4_i32 = arith.constant 4 : i32
    %228 = vector.broadcast %c4_i32 : i32 to vector<8x128xi32>
    %229 = arith.cmpi sge, %25, %228 : vector<8x128xi32>
    %c4_i32_53 = arith.constant 4 : i32
    %230 = tpu.dynamic_rotate %169 by %c4_i32_53 dim 1 : vector<8x128xf32>, i32 -> vector<8x128xf32>
    %cst_54 = arith.constant 1.000000e+00 : f32
    %231 = vector.broadcast %cst_54 : f32 to vector<8x128xf32>
    %232 = arith.select %229, %230, %231 : vector<8x128xi1>, vector<8x128xf32>
    %c4_i32_55 = arith.constant 4 : i32
    %233 = tpu.dynamic_rotate %174 by %c4_i32_55 dim 1 : vector<8x128xf32>, i32 -> vector<8x128xf32>
    %cst_56 = arith.constant 0.000000e+00 : f32
    %234 = vector.broadcast %cst_56 : f32 to vector<8x128xf32>
    %235 = arith.select %229, %233, %234 : vector<8x128xi1>, vector<8x128xf32>
    %c4_i32_57 = arith.constant 4 : i32
    %236 = tpu.dynamic_rotate %179 by %c4_i32_57 dim 1 : vector<8x128xf32>, i32 -> vector<8x128xf32>
    %cst_58 = arith.constant 0.000000e+00 : f32
    %237 = vector.broadcast %cst_58 : f32 to vector<8x128xf32>
    %238 = arith.select %229, %236, %237 : vector<8x128xi1>, vector<8x128xf32>
    %c4_i32_59 = arith.constant 4 : i32
    %239 = tpu.dynamic_rotate %184 by %c4_i32_59 dim 1 : vector<8x128xf32>, i32 -> vector<8x128xf32>
    %cst_60 = arith.constant 0.000000e+00 : f32
    %240 = vector.broadcast %cst_60 : f32 to vector<8x128xf32>
    %241 = arith.select %229, %239, %240 : vector<8x128xi1>, vector<8x128xf32>
    %c4_i32_61 = arith.constant 4 : i32
    %242 = tpu.dynamic_rotate %189 by %c4_i32_61 dim 1 : vector<8x128xf32>, i32 -> vector<8x128xf32>
    %cst_62 = arith.constant 1.000000e+00 : f32
    %243 = vector.broadcast %cst_62 : f32 to vector<8x128xf32>
    %244 = arith.select %229, %242, %243 : vector<8x128xi1>, vector<8x128xf32>
    %c4_i32_63 = arith.constant 4 : i32
    %245 = tpu.dynamic_rotate %194 by %c4_i32_63 dim 1 : vector<8x128xf32>, i32 -> vector<8x128xf32>
    %cst_64 = arith.constant 0.000000e+00 : f32
    %246 = vector.broadcast %cst_64 : f32 to vector<8x128xf32>
    %247 = arith.select %229, %245, %246 : vector<8x128xi1>, vector<8x128xf32>
    %c4_i32_65 = arith.constant 4 : i32
    %248 = tpu.dynamic_rotate %199 by %c4_i32_65 dim 1 : vector<8x128xf32>, i32 -> vector<8x128xf32>
    %cst_66 = arith.constant 0.000000e+00 : f32
    %249 = vector.broadcast %cst_66 : f32 to vector<8x128xf32>
    %250 = arith.select %229, %248, %249 : vector<8x128xi1>, vector<8x128xf32>
    %c4_i32_67 = arith.constant 4 : i32
    %251 = tpu.dynamic_rotate %204 by %c4_i32_67 dim 1 : vector<8x128xf32>, i32 -> vector<8x128xf32>
    %cst_68 = arith.constant 0.000000e+00 : f32
    %252 = vector.broadcast %cst_68 : f32 to vector<8x128xf32>
    %253 = arith.select %229, %251, %252 : vector<8x128xi1>, vector<8x128xf32>
    %c4_i32_69 = arith.constant 4 : i32
    %254 = tpu.dynamic_rotate %209 by %c4_i32_69 dim 1 : vector<8x128xf32>, i32 -> vector<8x128xf32>
    %cst_70 = arith.constant 1.000000e+00 : f32
    %255 = vector.broadcast %cst_70 : f32 to vector<8x128xf32>
    %256 = arith.select %229, %254, %255 : vector<8x128xi1>, vector<8x128xf32>
    %c4_i32_71 = arith.constant 4 : i32
    %257 = tpu.dynamic_rotate %215 by %c4_i32_71 dim 1 : vector<8x128xf32>, i32 -> vector<8x128xf32>
    %cst_72 = arith.constant 0.000000e+00 : f32
    %258 = vector.broadcast %cst_72 : f32 to vector<8x128xf32>
    %259 = arith.select %229, %257, %258 : vector<8x128xi1>, vector<8x128xf32>
    %c4_i32_73 = arith.constant 4 : i32
    %260 = tpu.dynamic_rotate %221 by %c4_i32_73 dim 1 : vector<8x128xf32>, i32 -> vector<8x128xf32>
    %cst_74 = arith.constant 0.000000e+00 : f32
    %261 = vector.broadcast %cst_74 : f32 to vector<8x128xf32>
    %262 = arith.select %229, %260, %261 : vector<8x128xi1>, vector<8x128xf32>
    %c4_i32_75 = arith.constant 4 : i32
    %263 = tpu.dynamic_rotate %227 by %c4_i32_75 dim 1 : vector<8x128xf32>, i32 -> vector<8x128xf32>
    %cst_76 = arith.constant 0.000000e+00 : f32
    %264 = vector.broadcast %cst_76 : f32 to vector<8x128xf32>
    %265 = arith.select %229, %263, %264 : vector<8x128xi1>, vector<8x128xf32>
    %266 = arith.mulf %232, %169 : vector<8x128xf32>
    %267 = arith.mulf %235, %184 : vector<8x128xf32>
    %268 = arith.addf %266, %267 : vector<8x128xf32>
    %269 = arith.mulf %238, %199 : vector<8x128xf32>
    %270 = arith.addf %268, %269 : vector<8x128xf32>
    %271 = arith.mulf %232, %174 : vector<8x128xf32>
    %272 = arith.mulf %235, %189 : vector<8x128xf32>
    %273 = arith.addf %271, %272 : vector<8x128xf32>
    %274 = arith.mulf %238, %204 : vector<8x128xf32>
    %275 = arith.addf %273, %274 : vector<8x128xf32>
    %276 = arith.mulf %232, %179 : vector<8x128xf32>
    %277 = arith.mulf %235, %194 : vector<8x128xf32>
    %278 = arith.addf %276, %277 : vector<8x128xf32>
    %279 = arith.mulf %238, %209 : vector<8x128xf32>
    %280 = arith.addf %278, %279 : vector<8x128xf32>
    %281 = arith.mulf %241, %169 : vector<8x128xf32>
    %282 = arith.mulf %244, %184 : vector<8x128xf32>
    %283 = arith.addf %281, %282 : vector<8x128xf32>
    %284 = arith.mulf %247, %199 : vector<8x128xf32>
    %285 = arith.addf %283, %284 : vector<8x128xf32>
    %286 = arith.mulf %241, %174 : vector<8x128xf32>
    %287 = arith.mulf %244, %189 : vector<8x128xf32>
    %288 = arith.addf %286, %287 : vector<8x128xf32>
    %289 = arith.mulf %247, %204 : vector<8x128xf32>
    %290 = arith.addf %288, %289 : vector<8x128xf32>
    %291 = arith.mulf %241, %179 : vector<8x128xf32>
    %292 = arith.mulf %244, %194 : vector<8x128xf32>
    %293 = arith.addf %291, %292 : vector<8x128xf32>
    %294 = arith.mulf %247, %209 : vector<8x128xf32>
    %295 = arith.addf %293, %294 : vector<8x128xf32>
    %296 = arith.mulf %250, %169 : vector<8x128xf32>
    %297 = arith.mulf %253, %184 : vector<8x128xf32>
    %298 = arith.addf %296, %297 : vector<8x128xf32>
    %299 = arith.mulf %256, %199 : vector<8x128xf32>
    %300 = arith.addf %298, %299 : vector<8x128xf32>
    %301 = arith.mulf %250, %174 : vector<8x128xf32>
    %302 = arith.mulf %253, %189 : vector<8x128xf32>
    %303 = arith.addf %301, %302 : vector<8x128xf32>
    %304 = arith.mulf %256, %204 : vector<8x128xf32>
    %305 = arith.addf %303, %304 : vector<8x128xf32>
    %306 = arith.mulf %250, %179 : vector<8x128xf32>
    %307 = arith.mulf %253, %194 : vector<8x128xf32>
    %308 = arith.addf %306, %307 : vector<8x128xf32>
    %309 = arith.mulf %256, %209 : vector<8x128xf32>
    %310 = arith.addf %308, %309 : vector<8x128xf32>
    %311 = arith.mulf %232, %215 : vector<8x128xf32>
    %312 = arith.mulf %235, %221 : vector<8x128xf32>
    %313 = arith.addf %311, %312 : vector<8x128xf32>
    %314 = arith.mulf %238, %227 : vector<8x128xf32>
    %315 = arith.addf %313, %314 : vector<8x128xf32>
    %316 = arith.addf %315, %259 : vector<8x128xf32>
    %317 = arith.mulf %241, %215 : vector<8x128xf32>
    %318 = arith.mulf %244, %221 : vector<8x128xf32>
    %319 = arith.addf %317, %318 : vector<8x128xf32>
    %320 = arith.mulf %247, %227 : vector<8x128xf32>
    %321 = arith.addf %319, %320 : vector<8x128xf32>
    %322 = arith.addf %321, %262 : vector<8x128xf32>
    %323 = arith.mulf %250, %215 : vector<8x128xf32>
    %324 = arith.mulf %253, %221 : vector<8x128xf32>
    %325 = arith.addf %323, %324 : vector<8x128xf32>
    %326 = arith.mulf %256, %227 : vector<8x128xf32>
    %327 = arith.addf %325, %326 : vector<8x128xf32>
    %328 = arith.addf %327, %265 : vector<8x128xf32>
    %c8_i32 = arith.constant 8 : i32
    %329 = vector.broadcast %c8_i32 : i32 to vector<8x128xi32>
    %330 = arith.cmpi sge, %25, %329 : vector<8x128xi32>
    %c8_i32_77 = arith.constant 8 : i32
    %331 = tpu.dynamic_rotate %270 by %c8_i32_77 dim 1 : vector<8x128xf32>, i32 -> vector<8x128xf32>
    %cst_78 = arith.constant 1.000000e+00 : f32
    %332 = vector.broadcast %cst_78 : f32 to vector<8x128xf32>
    %333 = arith.select %330, %331, %332 : vector<8x128xi1>, vector<8x128xf32>
    %c8_i32_79 = arith.constant 8 : i32
    %334 = tpu.dynamic_rotate %275 by %c8_i32_79 dim 1 : vector<8x128xf32>, i32 -> vector<8x128xf32>
    %cst_80 = arith.constant 0.000000e+00 : f32
    %335 = vector.broadcast %cst_80 : f32 to vector<8x128xf32>
    %336 = arith.select %330, %334, %335 : vector<8x128xi1>, vector<8x128xf32>
    %c8_i32_81 = arith.constant 8 : i32
    %337 = tpu.dynamic_rotate %280 by %c8_i32_81 dim 1 : vector<8x128xf32>, i32 -> vector<8x128xf32>
    %cst_82 = arith.constant 0.000000e+00 : f32
    %338 = vector.broadcast %cst_82 : f32 to vector<8x128xf32>
    %339 = arith.select %330, %337, %338 : vector<8x128xi1>, vector<8x128xf32>
    %c8_i32_83 = arith.constant 8 : i32
    %340 = tpu.dynamic_rotate %285 by %c8_i32_83 dim 1 : vector<8x128xf32>, i32 -> vector<8x128xf32>
    %cst_84 = arith.constant 0.000000e+00 : f32
    %341 = vector.broadcast %cst_84 : f32 to vector<8x128xf32>
    %342 = arith.select %330, %340, %341 : vector<8x128xi1>, vector<8x128xf32>
    %c8_i32_85 = arith.constant 8 : i32
    %343 = tpu.dynamic_rotate %290 by %c8_i32_85 dim 1 : vector<8x128xf32>, i32 -> vector<8x128xf32>
    %cst_86 = arith.constant 1.000000e+00 : f32
    %344 = vector.broadcast %cst_86 : f32 to vector<8x128xf32>
    %345 = arith.select %330, %343, %344 : vector<8x128xi1>, vector<8x128xf32>
    %c8_i32_87 = arith.constant 8 : i32
    %346 = tpu.dynamic_rotate %295 by %c8_i32_87 dim 1 : vector<8x128xf32>, i32 -> vector<8x128xf32>
    %cst_88 = arith.constant 0.000000e+00 : f32
    %347 = vector.broadcast %cst_88 : f32 to vector<8x128xf32>
    %348 = arith.select %330, %346, %347 : vector<8x128xi1>, vector<8x128xf32>
    %c8_i32_89 = arith.constant 8 : i32
    %349 = tpu.dynamic_rotate %300 by %c8_i32_89 dim 1 : vector<8x128xf32>, i32 -> vector<8x128xf32>
    %cst_90 = arith.constant 0.000000e+00 : f32
    %350 = vector.broadcast %cst_90 : f32 to vector<8x128xf32>
    %351 = arith.select %330, %349, %350 : vector<8x128xi1>, vector<8x128xf32>
    %c8_i32_91 = arith.constant 8 : i32
    %352 = tpu.dynamic_rotate %305 by %c8_i32_91 dim 1 : vector<8x128xf32>, i32 -> vector<8x128xf32>
    %cst_92 = arith.constant 0.000000e+00 : f32
    %353 = vector.broadcast %cst_92 : f32 to vector<8x128xf32>
    %354 = arith.select %330, %352, %353 : vector<8x128xi1>, vector<8x128xf32>
    %c8_i32_93 = arith.constant 8 : i32
    %355 = tpu.dynamic_rotate %310 by %c8_i32_93 dim 1 : vector<8x128xf32>, i32 -> vector<8x128xf32>
    %cst_94 = arith.constant 1.000000e+00 : f32
    %356 = vector.broadcast %cst_94 : f32 to vector<8x128xf32>
    %357 = arith.select %330, %355, %356 : vector<8x128xi1>, vector<8x128xf32>
    %c8_i32_95 = arith.constant 8 : i32
    %358 = tpu.dynamic_rotate %316 by %c8_i32_95 dim 1 : vector<8x128xf32>, i32 -> vector<8x128xf32>
    %cst_96 = arith.constant 0.000000e+00 : f32
    %359 = vector.broadcast %cst_96 : f32 to vector<8x128xf32>
    %360 = arith.select %330, %358, %359 : vector<8x128xi1>, vector<8x128xf32>
    %c8_i32_97 = arith.constant 8 : i32
    %361 = tpu.dynamic_rotate %322 by %c8_i32_97 dim 1 : vector<8x128xf32>, i32 -> vector<8x128xf32>
    %cst_98 = arith.constant 0.000000e+00 : f32
    %362 = vector.broadcast %cst_98 : f32 to vector<8x128xf32>
    %363 = arith.select %330, %361, %362 : vector<8x128xi1>, vector<8x128xf32>
    %c8_i32_99 = arith.constant 8 : i32
    %364 = tpu.dynamic_rotate %328 by %c8_i32_99 dim 1 : vector<8x128xf32>, i32 -> vector<8x128xf32>
    %cst_100 = arith.constant 0.000000e+00 : f32
    %365 = vector.broadcast %cst_100 : f32 to vector<8x128xf32>
    %366 = arith.select %330, %364, %365 : vector<8x128xi1>, vector<8x128xf32>
    %367 = arith.mulf %333, %270 : vector<8x128xf32>
    %368 = arith.mulf %336, %285 : vector<8x128xf32>
    %369 = arith.addf %367, %368 : vector<8x128xf32>
    %370 = arith.mulf %339, %300 : vector<8x128xf32>
    %371 = arith.addf %369, %370 : vector<8x128xf32>
    %372 = arith.mulf %333, %275 : vector<8x128xf32>
    %373 = arith.mulf %336, %290 : vector<8x128xf32>
    %374 = arith.addf %372, %373 : vector<8x128xf32>
    %375 = arith.mulf %339, %305 : vector<8x128xf32>
    %376 = arith.addf %374, %375 : vector<8x128xf32>
    %377 = arith.mulf %333, %280 : vector<8x128xf32>
    %378 = arith.mulf %336, %295 : vector<8x128xf32>
    %379 = arith.addf %377, %378 : vector<8x128xf32>
    %380 = arith.mulf %339, %310 : vector<8x128xf32>
    %381 = arith.addf %379, %380 : vector<8x128xf32>
    %382 = arith.mulf %342, %270 : vector<8x128xf32>
    %383 = arith.mulf %345, %285 : vector<8x128xf32>
    %384 = arith.addf %382, %383 : vector<8x128xf32>
    %385 = arith.mulf %348, %300 : vector<8x128xf32>
    %386 = arith.addf %384, %385 : vector<8x128xf32>
    %387 = arith.mulf %342, %275 : vector<8x128xf32>
    %388 = arith.mulf %345, %290 : vector<8x128xf32>
    %389 = arith.addf %387, %388 : vector<8x128xf32>
    %390 = arith.mulf %348, %305 : vector<8x128xf32>
    %391 = arith.addf %389, %390 : vector<8x128xf32>
    %392 = arith.mulf %342, %280 : vector<8x128xf32>
    %393 = arith.mulf %345, %295 : vector<8x128xf32>
    %394 = arith.addf %392, %393 : vector<8x128xf32>
    %395 = arith.mulf %348, %310 : vector<8x128xf32>
    %396 = arith.addf %394, %395 : vector<8x128xf32>
    %397 = arith.mulf %351, %270 : vector<8x128xf32>
    %398 = arith.mulf %354, %285 : vector<8x128xf32>
    %399 = arith.addf %397, %398 : vector<8x128xf32>
    %400 = arith.mulf %357, %300 : vector<8x128xf32>
    %401 = arith.addf %399, %400 : vector<8x128xf32>
    %402 = arith.mulf %351, %275 : vector<8x128xf32>
    %403 = arith.mulf %354, %290 : vector<8x128xf32>
    %404 = arith.addf %402, %403 : vector<8x128xf32>
    %405 = arith.mulf %357, %305 : vector<8x128xf32>
    %406 = arith.addf %404, %405 : vector<8x128xf32>
    %407 = arith.mulf %351, %280 : vector<8x128xf32>
    %408 = arith.mulf %354, %295 : vector<8x128xf32>
    %409 = arith.addf %407, %408 : vector<8x128xf32>
    %410 = arith.mulf %357, %310 : vector<8x128xf32>
    %411 = arith.addf %409, %410 : vector<8x128xf32>
    %412 = arith.mulf %333, %316 : vector<8x128xf32>
    %413 = arith.mulf %336, %322 : vector<8x128xf32>
    %414 = arith.addf %412, %413 : vector<8x128xf32>
    %415 = arith.mulf %339, %328 : vector<8x128xf32>
    %416 = arith.addf %414, %415 : vector<8x128xf32>
    %417 = arith.addf %416, %360 : vector<8x128xf32>
    %418 = arith.mulf %342, %316 : vector<8x128xf32>
    %419 = arith.mulf %345, %322 : vector<8x128xf32>
    %420 = arith.addf %418, %419 : vector<8x128xf32>
    %421 = arith.mulf %348, %328 : vector<8x128xf32>
    %422 = arith.addf %420, %421 : vector<8x128xf32>
    %423 = arith.addf %422, %363 : vector<8x128xf32>
    %424 = arith.mulf %351, %316 : vector<8x128xf32>
    %425 = arith.mulf %354, %322 : vector<8x128xf32>
    %426 = arith.addf %424, %425 : vector<8x128xf32>
    %427 = arith.mulf %357, %328 : vector<8x128xf32>
    %428 = arith.addf %426, %427 : vector<8x128xf32>
    %429 = arith.addf %428, %366 : vector<8x128xf32>
    %c16_i32 = arith.constant 16 : i32
    %430 = vector.broadcast %c16_i32 : i32 to vector<8x128xi32>
    %431 = arith.cmpi sge, %25, %430 : vector<8x128xi32>
    %c16_i32_101 = arith.constant 16 : i32
    %432 = tpu.dynamic_rotate %371 by %c16_i32_101 dim 1 : vector<8x128xf32>, i32 -> vector<8x128xf32>
    %cst_102 = arith.constant 1.000000e+00 : f32
    %433 = vector.broadcast %cst_102 : f32 to vector<8x128xf32>
    %434 = arith.select %431, %432, %433 : vector<8x128xi1>, vector<8x128xf32>
    %c16_i32_103 = arith.constant 16 : i32
    %435 = tpu.dynamic_rotate %376 by %c16_i32_103 dim 1 : vector<8x128xf32>, i32 -> vector<8x128xf32>
    %cst_104 = arith.constant 0.000000e+00 : f32
    %436 = vector.broadcast %cst_104 : f32 to vector<8x128xf32>
    %437 = arith.select %431, %435, %436 : vector<8x128xi1>, vector<8x128xf32>
    %c16_i32_105 = arith.constant 16 : i32
    %438 = tpu.dynamic_rotate %381 by %c16_i32_105 dim 1 : vector<8x128xf32>, i32 -> vector<8x128xf32>
    %cst_106 = arith.constant 0.000000e+00 : f32
    %439 = vector.broadcast %cst_106 : f32 to vector<8x128xf32>
    %440 = arith.select %431, %438, %439 : vector<8x128xi1>, vector<8x128xf32>
    %c16_i32_107 = arith.constant 16 : i32
    %441 = tpu.dynamic_rotate %386 by %c16_i32_107 dim 1 : vector<8x128xf32>, i32 -> vector<8x128xf32>
    %cst_108 = arith.constant 0.000000e+00 : f32
    %442 = vector.broadcast %cst_108 : f32 to vector<8x128xf32>
    %443 = arith.select %431, %441, %442 : vector<8x128xi1>, vector<8x128xf32>
    %c16_i32_109 = arith.constant 16 : i32
    %444 = tpu.dynamic_rotate %391 by %c16_i32_109 dim 1 : vector<8x128xf32>, i32 -> vector<8x128xf32>
    %cst_110 = arith.constant 1.000000e+00 : f32
    %445 = vector.broadcast %cst_110 : f32 to vector<8x128xf32>
    %446 = arith.select %431, %444, %445 : vector<8x128xi1>, vector<8x128xf32>
    %c16_i32_111 = arith.constant 16 : i32
    %447 = tpu.dynamic_rotate %396 by %c16_i32_111 dim 1 : vector<8x128xf32>, i32 -> vector<8x128xf32>
    %cst_112 = arith.constant 0.000000e+00 : f32
    %448 = vector.broadcast %cst_112 : f32 to vector<8x128xf32>
    %449 = arith.select %431, %447, %448 : vector<8x128xi1>, vector<8x128xf32>
    %c16_i32_113 = arith.constant 16 : i32
    %450 = tpu.dynamic_rotate %401 by %c16_i32_113 dim 1 : vector<8x128xf32>, i32 -> vector<8x128xf32>
    %cst_114 = arith.constant 0.000000e+00 : f32
    %451 = vector.broadcast %cst_114 : f32 to vector<8x128xf32>
    %452 = arith.select %431, %450, %451 : vector<8x128xi1>, vector<8x128xf32>
    %c16_i32_115 = arith.constant 16 : i32
    %453 = tpu.dynamic_rotate %406 by %c16_i32_115 dim 1 : vector<8x128xf32>, i32 -> vector<8x128xf32>
    %cst_116 = arith.constant 0.000000e+00 : f32
    %454 = vector.broadcast %cst_116 : f32 to vector<8x128xf32>
    %455 = arith.select %431, %453, %454 : vector<8x128xi1>, vector<8x128xf32>
    %c16_i32_117 = arith.constant 16 : i32
    %456 = tpu.dynamic_rotate %411 by %c16_i32_117 dim 1 : vector<8x128xf32>, i32 -> vector<8x128xf32>
    %cst_118 = arith.constant 1.000000e+00 : f32
    %457 = vector.broadcast %cst_118 : f32 to vector<8x128xf32>
    %458 = arith.select %431, %456, %457 : vector<8x128xi1>, vector<8x128xf32>
    %c16_i32_119 = arith.constant 16 : i32
    %459 = tpu.dynamic_rotate %417 by %c16_i32_119 dim 1 : vector<8x128xf32>, i32 -> vector<8x128xf32>
    %cst_120 = arith.constant 0.000000e+00 : f32
    %460 = vector.broadcast %cst_120 : f32 to vector<8x128xf32>
    %461 = arith.select %431, %459, %460 : vector<8x128xi1>, vector<8x128xf32>
    %c16_i32_121 = arith.constant 16 : i32
    %462 = tpu.dynamic_rotate %423 by %c16_i32_121 dim 1 : vector<8x128xf32>, i32 -> vector<8x128xf32>
    %cst_122 = arith.constant 0.000000e+00 : f32
    %463 = vector.broadcast %cst_122 : f32 to vector<8x128xf32>
    %464 = arith.select %431, %462, %463 : vector<8x128xi1>, vector<8x128xf32>
    %c16_i32_123 = arith.constant 16 : i32
    %465 = tpu.dynamic_rotate %429 by %c16_i32_123 dim 1 : vector<8x128xf32>, i32 -> vector<8x128xf32>
    %cst_124 = arith.constant 0.000000e+00 : f32
    %466 = vector.broadcast %cst_124 : f32 to vector<8x128xf32>
    %467 = arith.select %431, %465, %466 : vector<8x128xi1>, vector<8x128xf32>
    %468 = arith.mulf %434, %417 : vector<8x128xf32>
    %469 = arith.mulf %437, %423 : vector<8x128xf32>
    %470 = arith.addf %468, %469 : vector<8x128xf32>
    %471 = arith.mulf %440, %429 : vector<8x128xf32>
    %472 = arith.addf %470, %471 : vector<8x128xf32>
    %473 = arith.addf %472, %461 : vector<8x128xf32>
    %474 = arith.mulf %443, %417 : vector<8x128xf32>
    %475 = arith.mulf %446, %423 : vector<8x128xf32>
    %476 = arith.addf %474, %475 : vector<8x128xf32>
    %477 = arith.mulf %449, %429 : vector<8x128xf32>
    %478 = arith.addf %476, %477 : vector<8x128xf32>
    %479 = arith.addf %478, %464 : vector<8x128xf32>
    %480 = arith.mulf %452, %417 : vector<8x128xf32>
    %481 = arith.mulf %455, %423 : vector<8x128xf32>
    %482 = arith.addf %480, %481 : vector<8x128xf32>
    %483 = arith.mulf %458, %429 : vector<8x128xf32>
    %484 = arith.addf %482, %483 : vector<8x128xf32>
    %485 = arith.addf %484, %467 : vector<8x128xf32>
    %c0_125 = arith.constant 0 : index
    %c0_126 = arith.constant 0 : index
    %c0_127 = arith.constant 0 : index
    %486 = vector.load %arg3[%c0_125, %c0_126, %c0_127] : memref<3x8x128xf32, #tpu.memory_space<vmem>>, vector<1x8x128xf32>
    %487 = vector.shape_cast %486 : vector<1x8x128xf32> to vector<8x128xf32>
    %488 = vector.shape_cast %473 : vector<8x128xf32> to vector<1x8x128xf32>
    tpu.vector_store %arg3[%c0_125, %c0_126, %c0_127], %488 {strides = array<i32>} : memref<3x8x128xf32, #tpu.memory_space<vmem>>, vector<1x8x128xf32>,
    %c1 = arith.constant 1 : index
    %c0_128 = arith.constant 0 : index
    %c0_129 = arith.constant 0 : index
    %489 = vector.load %arg3[%c1, %c0_128, %c0_129] : memref<3x8x128xf32, #tpu.memory_space<vmem>>, vector<1x8x128xf32>
    %490 = vector.shape_cast %489 : vector<1x8x128xf32> to vector<8x128xf32>
    %491 = vector.shape_cast %479 : vector<8x128xf32> to vector<1x8x128xf32>
    tpu.vector_store %arg3[%c1, %c0_128, %c0_129], %491 {strides = array<i32>} : memref<3x8x128xf32, #tpu.memory_space<vmem>>, vector<1x8x128xf32>,
    %c2 = arith.constant 2 : index
    %c0_130 = arith.constant 0 : index
    %c0_131 = arith.constant 0 : index
    %492 = vector.load %arg3[%c2, %c0_130, %c0_131] : memref<3x8x128xf32, #tpu.memory_space<vmem>>, vector<1x8x128xf32>
    %493 = vector.shape_cast %492 : vector<1x8x128xf32> to vector<8x128xf32>
    %494 = vector.shape_cast %485 : vector<8x128xf32> to vector<1x8x128xf32>
    tpu.vector_store %arg3[%c2, %c0_130, %c0_131], %494 {strides = array<i32>} : memref<3x8x128xf32, #tpu.memory_space<vmem>>, vector<1x8x128xf32>,
    return
  }
  func.func @transform_0(%arg0: i32) -> (i32, i32) {
    %c0_i32 = arith.constant 0 : i32
    %c0_i32_0 = arith.constant 0 : i32
    return %arg0, %c0_i32 : i32, i32
  }
  func.func @transform_1(%arg0: i32) -> (i32, i32) {
    %c0_i32 = arith.constant 0 : i32
    %c0_i32_0 = arith.constant 0 : i32
    %c0_i32_1 = arith.constant 0 : i32
    return %c0_i32, %c0_i32_0 : i32, i32
  }
  func.func @transform_2(%arg0: i32) -> (i32, i32, i32) {
    %c0_i32 = arith.constant 0 : i32
    %c0_i32_0 = arith.constant 0 : i32
    %c0_i32_1 = arith.constant 0 : i32
    return %c0_i32, %arg0, %c0_i32_0 : i32, i32, i32
  }
}

</mosaic_0001>

<bundles_post_ra>
// kernel: tpu_custom_call.1
= control target key start
LH: loop header
LB: loop body
LE: loop exit
PB: predicated region body
PF: predicated region fallthrough
CT: control target
= control target key end

     0   :  { %7 = vsyncpa [#allocation3], 0  ;;  %s1582_s0 = inlined_call_operand.hbm [shape: f32[8,128], index: 0, kind: input, shape index: {}]   ;;  %s1583_s1 = inlined_call_operand.hbm [shape: f32[3,128], index: 1, kind: input, shape index: {}]   ;;  %s1584_s2 = inlined_call_operand.hbm [shape: f32[3,8,128], index: 2, kind: output, shape index: {}]  }
   0x1   :  { %8 = vsyncpa [#allocation6], 0 }
   0x2   :  { %9 = vsyncpa [#allocation4], 0  ;;  %s15_s11 = sshll.u32 %s1582_s0, 4  ;;  %s946_s12 = smov [#allocation2]   ;;  %s16_s11 = int_to_ptr.hbm [resolvable:$true] %s15_s11 }
   0x3   :  { %s17_s13 = sshll.u32 %s946_s12, 4  ;;  %s26_s16 = sshll.u32 %s1583_s1, 4  ;;  %s18_s13 = int_to_ptr.vmem [resolvable:$true] %s17_s13  ;;  %s27_s16 = int_to_ptr.hbm [resolvable:$true] %s26_s16 }
   0x4   :  { %20 = dma.hbm_to_vmem [thread:$0]  %s16_s11, 128, %s18_s13, [#allocation3]  }
   0x5   :  { %s947_s17 = smov [#allocation5]  }
   0x6   :  { %s28_s18 = sshll.u32 %s947_s17, 4  ;;  %s29_s18 = int_to_ptr.vmem [resolvable:$true] %s28_s18 }
   0x7   :  { %31 = dma.hbm_to_vmem [thread:$0]  %s27_s16, 64, %s29_s18, [#allocation6]  }
   0x8   :  { %940 = dma.done.wait [#allocation3], 128  }
   0x9   :  { %941 = vsyncadd [#allocation3], 4294967168 }
   0xa   :  { %942 = dma.done.wait [#allocation6], 64  }
   0xb   :  { %943 = vsyncadd [#allocation6], 4294967232  ;;  %v41_v0 = vld [vmem:[#allocation5] sm:$0x7]  ;;  %v984_v1 = vld [vmem:[#allocation2] sm:$0xff]  ;;  %s948_s0 = smov 1  }
   0xc   :  { %v986_v2 = vperm.slane %v41_v0, 0  ;;  %v48_v3 = vand.u32 2139095040, %v984_v1  ;;  %v991_v4 = vperm.slane %v41_v0, 1  ;;  %v45_v6 = vand.u32 2147483647, %v984_v1  ;;  %s957_s1 = smov 2  }
   0xd   :  { %v949_v16 = vmov 683565275   ;;  %v950_v18 = vmov 2475754826   ;;  %v951_v20 = vmov 2131351028  }
   0xe   :  { %366 = vrot.lane.b32.xlu0 %v986_v2, %s948_s0  ;;  %v49_v5 = vshrl.u32 %v48_v3, 23  ;;  %v995_v8 = vsub.f32 0.0, %v991_v4  ;;  %v52_v10 = vand.u32 8388607, %v45_v6  ;;  %v952_v22 = vmov 2102212464  }
   0xf   :  { %v953_v24 = vmov 920167782   ;;  %v954_v30 = vmov 1326507024   ;;  %v955_v36 = vmov 0.0   ;;  %v1008_v37 = vperm.slane %v41_v0, 2 }
  0x10   :  { %v845_v7 = vadd.s32 4294967169, %v49_v5  ;;  %v53_v13 = vor.u32 8388608, %v52_v10  ;;  %vm47_vm12 = vcmp.lt.s32.totalorder %v984_v1, 0  ;;  %vm46_vm13 = vcmp.le.f32.partialorder %v45_v6, 0.7853982  ;;  %s958_s19 = smov 4  }
  0x11   :  { %v1028_v48 = vmul.f32 %v1008_v37, %v986_v2  ;;  %s959_s20 = smov 8   ;;  %s960_s21 = smov 16  }
  0x12   :  { %v55_v9 = vadd.s32 1, %v845_v7  ;;  %v1004_v32 = vshll.u32 %v53_v13, 8  ;;  %s961_s22 = smov [#allocation7]   ;;  %s831_s26 = sshll.u32 %s1584_s2, 4  ;;  %s832_s26 = int_to_ptr.hbm [resolvable:$true] %s831_s26 }
  0x13   :  { %s829_s23 = sshll.u32 %s961_s22, 4  ;;  %s962_s27 = smov 128   ;;  %s830_s23 = int_to_ptr.vmem [resolvable:$true] %s829_s23 }
  0x14   :  { %vm56_vm0 = vcmp.gt.s32.totalorder %v55_v9, 0  ;;  %v94_v46 = vand.u32 65535, %v1004_v32  ;;  %v95_v47 = vshrl.u32 %v1004_v32, 16 }
  0x15   :  { %v57_v11 = vsel %vm56_vm0, %v55_v9, 0 }
  0x16   :  { %369 = vrot.lane.b32.xlu0 %v995_v8, %s948_s0  ;;  %v59_v12 = vand.u32 31, %v57_v11  ;;  %v1001_v14 = vshrl.u32 %v57_v11, 5 }
  0x18   :  { %v60_v15 = vsub.s32 32, %v59_v12  ;;  %v62_v17 = vshll.u32 %v949_v16, %v59_v12  ;;  %v65_v19 = vshll.u32 %v950_v18, %v59_v12  ;;  %v68_v21 = vshll.u32 %v951_v20, %v59_v12 }
  0x19   :  { %v71_v23 = vshll.u32 %v952_v22, %v59_v12  ;;  %v74_v25 = vshll.u32 %v953_v24, %v59_v12  ;;  %vm77_vm1 = vcmp.lt.s32.totalorder %v1001_v14, 1  ;;  %vm80_vm2 = vcmp.lt.s32.totalorder %v1001_v14, 4 }
  0x1a   :  { %v63_v26 = vshrl.u32 %v950_v18, %v60_v15  ;;  %v66_v27 = vshrl.u32 %v951_v20, %v60_v15  ;;  %v69_v28 = vshrl.u32 %v952_v22, %v60_v15  ;;  %v72_v29 = vshrl.u32 %v953_v24, %v60_v15 }
  0x1b   :  { %v75_v31 = vshrl.u32 %v954_v30, %v60_v15  ;;  %vm79_vm3 = vcmp.lt.s32.totalorder %v1001_v14, 3  ;;  %vm78_vm4 = vcmp.lt.s32.totalorder %v1001_v14, 2  ;;  %v61_v55 = vshrl.u32 %v949_v16, %v60_v15 }
  0x1c   :  { %v64_v33 = vor.u32 %v63_v26, %v62_v17  ;;  %v67_v34 = vor.u32 %v66_v27, %v65_v19  ;;  %v70_v35 = vor.u32 %v69_v28, %v68_v21  ;;  %v73_v38 = vor.u32 %v72_v29, %v71_v23 }
  0x1d   :  { %v76_v39 = vor.u32 %v75_v31, %v74_v25  ;;  %v956_v12 = vmov 0  }
  0x1e   :  { %372 = vrot.lane.b32.xlu0 %v955_v36, %s948_s0  ;;  %v85_v40 = vsel %vm77_vm1, %v64_v33, %v67_v34  ;;  %v89_v41 = vsel %vm77_vm1, %v67_v34, %v70_v35  ;;  %v86_v42 = vsel %vm80_vm2, %v73_v38, 920167782  ;;  %v81_v9 = vsel %vm77_vm1, %v61_v55, %v64_v33 }
  0x1f   :  { %v90_v43 = vsel %vm80_vm2, %v76_v39, 1326507024  ;;  %v87_v44 = vsel %vm79_vm3, %v70_v35, %v86_v42  ;;  %v82_v11 = vsel %vm80_vm2, %v70_v35, 2102212464 }
  0x20   :  { %v91_v45 = vsel %vm79_vm3, %v73_v38, %v90_v43  ;;  %v88_v49 = vsel %vm78_vm4, %v85_v40, %v87_v44  ;;  %v83_v22 = vsel %vm79_vm3, %v67_v34, %v82_v11 }
  0x21   :  { %v92_v50 = vsel %vm78_vm4, %v89_v41, %v91_v45  ;;  %v118_v53 = vand.u32 65535, %v88_v49  ;;  %v119_v54 = vshrl.u32 %v88_v49, 16  ;;  %v84_v30 = vsel %vm78_vm4, %v81_v9, %v83_v22 }
  0x22   :  { %v96_v51 = vand.u32 65535, %v92_v50  ;;  %v97_v52 = vshrl.u32 %v92_v50, 16  ;;  %v138_v36 = vmul.u32 %v1004_v32, %v84_v30  ;;  %vm188_vm4 = vweird.f32 %v984_v1 }
  0x23   :  { %v120_v59 = vmul.u32 %v118_v53, %v94_v46  ;;  %v121_v60 = vmul.u32 %v119_v54, %v94_v46  ;;  %v122_v61 = vmul.u32 %v118_v53, %v95_v47  ;;  %v123_v3 = vmul.u32 %v119_v54, %v95_v47 }
  0x24   :  { %v98_v56 = vmul.u32 %v96_v51, %v94_v46  ;;  %v99_v57 = vmul.u32 %v97_v52, %v94_v46  ;;  %v100_v58 = vmul.u32 %v96_v51, %v95_v47  ;;  %v101_v62 = vmul.u32 %v97_v52, %v95_v47 }
  0x25   :  { %v124_v5 = vshll.u32 %v121_v60, 16  ;;  %v126_v7 = vshll.u32 %v122_v61, 16  ;;  %v125_v20 = vshrl.u32 %v121_v60, 16  ;;  %v127_v26 = vshrl.u32 %v122_v61, 16 }
  0x26   :  { %393 = vrot.lane.b32.xlu0 %v1028_v48, %s948_s0  ;;  %v102_v63 = vshll.u32 %v99_v57, 16  ;;  %v104_v0 = vshll.u32 %v100_v58, 16  ;;  %v103_v16 = vshrl.u32 %v99_v57, 16  ;;  %v105_v23 = vshrl.u32 %v100_v58, 16 }
  0x27   :  { %vm128_vm6 = vc.u32 %v120_v59, %v124_v5  ;;  %v130_v15 = vadd.s32 %v124_v5, %v120_v59 }
  0x28   :  { %vm106_vm5 = vc.u32 %v98_v56, %v102_v63  ;;  %v108_v10 = vadd.s32 %v102_v63, %v98_v56  ;;  %v129_v18 = vsel %vm128_vm6, 1, %v956_v12 }
  0x29   :  { %v107_v13 = vsel %vm106_vm5, 1, %v956_v12  ;;  %v131_v21 = vadd.s32 %v129_v18, %v123_v3  ;;  %vm132_vm8 = vc.u32 %v130_v15, %v126_v7  ;;  %v134_v29 = vadd.s32 %v130_v15, %v126_v7 }
  0x2a   :  { %v109_v17 = vadd.s32 %v107_v13, %v101_v62  ;;  %vm110_vm7 = vc.u32 %v108_v10, %v104_v0  ;;  %v133_v25 = vsel %vm132_vm8, 1, %v956_v12 }
  0x2b   :  { %v111_v19 = vsel %vm110_vm7, 1, %v956_v12  ;;  %v135_v27 = vadd.s32 %v133_v25, %v131_v21 }
  0x2c   :  { %v113_v24 = vadd.s32 %v111_v19, %v109_v17 }
  0x2d   :  { %v136_v31 = vadd.s32 %v135_v27, %v125_v20 }
  0x2e   :  { %v114_v28 = vadd.s32 %v113_v24, %v103_v16 }
  0x2f   :  { %v137_v35 = vadd.s32 %v136_v31, %v127_v26 }
  0x30   :  { %v115_v33 = vadd.s32 %v114_v28, %v105_v23 }
  0x31   :  { %v141_v38 = vadd.s32 1, %v137_v35 }
  0x32   :  { %vm140_vm9 = vc.u32 %v115_v33, %v134_v29  ;;  %v139_v14 = vadd.s32 %v134_v29, %v115_v33 }
  0x33   :  { %v142_v39 = vsel %vm140_vm9, %v141_v38, %v137_v35 }
  0x34   :  { %v143_v40 = vadd.s32 %v142_v39, %v138_v36 }
  0x36   :  { %v144_v34 = vadd.s32 536870912, %v143_v40 }
  0x38   :  { %v145_v41 = vshrl.u32 %v144_v34, 30 }
  0x3a   :  { %v146_v42 = vshll.u32 %v145_v41, 30  ;;  %v169_v60 = vsub.s32 4, %v145_v41 }
  0x3c   :  { %v147_v43 = vsub.s32 %v143_v40, %v146_v42  ;;  %v170_v63 = vsel %vm47_vm12, %v169_v60, %v145_v41  ;;  %v363_v40 = vlaneseq }
  0x3d   :  { %v172_v5 = vsel %vm46_vm13, 0, %v170_v63 }
  0x3e   :  { %vm148_vm10 = vcmp.lt.s32.totalorder %v147_v43, 0  ;;  %v149_v44 = vsub.s32 0, %v147_v43  ;;  %v343_v12 = vadd.s32 3, %v172_v5  ;;  %v189_v18 = vand.u32 3, %v172_v5 }
  0x3f   :  { %v1073_v34 = vand.u32 127, %v363_v40 }
  0x40   :  { %v150_v45 = vsel %vm148_vm10, %v149_v44, %v147_v43  ;;  %v344_v19 = vand.u32 3, %v343_v12  ;;  %vm194_vm14 = vcmp.eq.s32.totalorder %v189_v18, 2  ;;  %vm190_vm0 = vcmp.lt.s32.totalorder %v189_v18, 2 }
  0x41   :  { %v151_v46 = vclz %v150_v45  ;;  %vm191_vm1 = vcmp.eq.s32.totalorder %v189_v18, 0  ;;  %vm365_vm5 = vcmp.ge.s32.totalorder %v1073_v34, 1  ;;  %vm465_vm6 = vcmp.ge.s32.totalorder %v1073_v34, 2 }
  0x42   :  { %vm349_vm15 = vcmp.eq.s32.totalorder %v344_v19, 2  ;;  %vm346_vm2 = vcmp.eq.s32.totalorder %v344_v19, 0  ;;  %vm345_vm3 = vcmp.lt.s32.totalorder %v344_v19, 2  ;;  %vm565_vm7 = vcmp.ge.s32.totalorder %v1073_v34, 4 }
  0x43   :  { %v846_v47 = vadd.s32 4294967294, %v151_v46  ;;  %vm665_vm8 = vcmp.ge.s32.totalorder %v1073_v34, 8  ;;  %vm765_vm9 = vcmp.ge.s32.totalorder %v1073_v34, 16 }
  0x45   :  { %vm847_vm11 = vcmp.lt.s32.totalorder %v846_v47, 0 }
  0x46   :  { %v154_v49 = vsel %vm847_vm11, 0, %v846_v47 }
  0x47   :  { %v155_v50 = vsub.s32 32, %v154_v49  ;;  %v156_v51 = vshll.u32 %v147_v43, %v154_v49  ;;  %v159_v52 = vsub.s32 4294967266, %v154_v49 }
  0x49   :  { %v157_v32 = vshrl.u32 %v139_v14, %v155_v50  ;;  %v160_v53 = vadd.s32 127, %v159_v52 }
  0x4b   :  { %v158_v54 = vor.u32 %v157_v32, %v156_v51  ;;  %v161_v55 = vshll.u32 %v160_v53, 23 }
  0x4d   :  { %v162_v56 = vor.u32 4788187, %v161_v55  ;;  %v165_v57 = vcvt.s32.f32 %v158_v54 }
  0x4f   :  { %v163_v58 = vand.u32 2147483647, %v162_v56 }
  0x51   :  { %v166_v59 = vmul.f32 %v165_v57, %v163_v58 }
  0x53   :  { %v167_v61 = vxor.u32 2147483648, %v166_v59 }
  0x55   :  { %v168_v62 = vsel %vm47_vm12, %v167_v61, %v166_v59 }
  0x56   :  { %v171_v0 = vsel %vm46_vm13, %v984_v1, %v168_v62 }
  0x57   :  { %v173_v3 = vmul.f32 %v171_v0, %v171_v0 }
  0x59   :  { %v174_v7 = vmul.f32 -0.001358992, %v173_v3  ;;  %v181_v9 = vmul.f32 -0.00019511016, %v173_v3 }
  0x5b   :  { %v175_v10 = vadd.f32 0.041655596, %v174_v7  ;;  %v182_v11 = vadd.f32 0.008332121, %v181_v9 }
  0x5d   :  { %v176_v13 = vmul.f32 %v175_v10, %v173_v3  ;;  %v183_v15 = vmul.f32 %v182_v11, %v173_v3 }
  0x5f   :  { %v177_v16 = vadd.f32 -0.4999988, %v176_v13  ;;  %v184_v17 = vadd.f32 -0.16666654, %v183_v15 }
  0x61   :  { %v178_v20 = vmul.f32 %v177_v16, %v173_v3  ;;  %v185_v6 = vmul.f32 %v184_v17, %v173_v3 }
  0x63   :  { %v179_v21 = vadd.f32 1.0, %v178_v20  ;;  %v186_v22 = vadd.f32 1.0, %v185_v6 }
  0x65   :  { %v187_v23 = vmul.f32 %v186_v22, %v171_v0  ;;  %v195_v24 = vxor.u32 2147483648, %v179_v21 }
  0x67   :  { %v192_v25 = vxor.u32 2147483648, %v187_v23  ;;  %v351_v26 = vsel %vm349_vm15, %v195_v24, %v187_v23  ;;  %v196_v27 = vsel %vm194_vm14, %v195_v24, %v187_v23 }
  0x69   :  { %v348_v28 = vsel %vm346_vm2, %v179_v21, %v192_v25  ;;  %v193_v29 = vsel %vm191_vm1, %v179_v21, %v192_v25 }
  0x6a   :  { %v352_v30 = vsel %vm345_vm3, %v348_v28, %v351_v26  ;;  %v197_v31 = vsel %vm190_vm0, %v193_v29, %v196_v27 }
  0x6b   :  { %v353_v33 = vsel %vm188_vm4, nan, %v352_v30  ;;  %v1050_v35 = vsel %vm188_vm4, nan, %v197_v31 }
  0x6c   :  { %v1053_v36 = vmul.f32 %v353_v33, %v991_v4  ;;  %v355_v38 = vmul.f32 %v1050_v35, %v991_v4  ;;  %v1061_v1 = vmul.f32 %v353_v33, %v986_v2  ;;  %v1065_v39 = vmul.f32 %v1050_v35, %v986_v2 }
  0x6d   :  { %v1071_v4 = vsub.f32 0.0, %v353_v33 }
  0x6e   :  { %384 = vrot.lane.b32.xlu2 %v1053_v36, %s948_s0  ;;  %375 = vrot.lane.b32.xlu1 %v355_v38, %s948_s0  ;;  %v1081_v42 = vmul.f32 %v355_v38, %v1008_v37  ;;  %v1085_v43 = vmul.f32 %v1053_v36, %v1008_v37 }
  0x76   :  { %387 = vrot.lane.b32.xlu2 %v1061_v1, %s948_s0  ;;  %378 = vrot.lane.b32.xlu1 %v1065_v39, %s948_s0 }
  0x7e   :  { %390 = vrot.lane.b32.xlu2 %v1050_v35, %s948_s0  ;;  %381 = vrot.lane.b32.xlu1 %v1071_v4, %s948_s0 }
  0x80   :  { %v367_v41 = vpop.permute.xlu0 %366 }
  0x81   :  { %v368_v44 = vsel %vm365_vm5, %v367_v41, 1.0 }
  0x82   :  { %v412_v45 = vmul.f32 0.0, %v368_v44  ;;  %v402_v49 = vmul.f32 %v368_v44, %v986_v2  ;;  %v407_v37 = vmul.f32 %v368_v44, %v995_v8  ;;  %v447_v62 = vmul.f32 %v368_v44, %v1028_v48 }
  0x86   :  { %396 = vrot.lane.b32.xlu1 %v1081_v42, %s948_s0  ;;  %399 = vrot.lane.b32.xlu2 %v1085_v43, %s948_s0 }
  0x88   :  { %v370_v46 = vpop.permute.xlu0 %369 }
  0x89   :  { %v371_v47 = vsel %vm365_vm5, %v370_v46, 0.0 }
  0x8a   :  { %v413_v14 = vmul.f32 %v371_v47, %v1071_v4  ;;  %v403_v50 = vmul.f32 %v371_v47, %v355_v38  ;;  %v408_v51 = vmul.f32 %v371_v47, %v1065_v39  ;;  %v448_v63 = vmul.f32 %v371_v47, %v1081_v42 }
  0x8c   :  { %v414_v52 = vadd.f32 %v413_v14, %v412_v45  ;;  %v404_v32 = vadd.f32 %v403_v50, %v402_v49  ;;  %v409_v53 = vadd.f32 %v408_v51, %v407_v37  ;;  %v449_v3 = vadd.f32 %v448_v63, %v447_v62 }
  0x90   :  { %v373_v54 = vpop.permute.xlu0 %372 }
  0x91   :  { %v374_v55 = vsel %vm365_vm5, %v373_v54, 0.0 }
  0x92   :  { %v405_v56 = vmul.f32 %v374_v55, %v1053_v36  ;;  %v410_v57 = vmul.f32 %v374_v55, %v1061_v1  ;;  %v415_v58 = vmul.f32 %v374_v55, %v1050_v35  ;;  %v450_v0 = vmul.f32 %v374_v55, %v1085_v43 }
  0x94   :  { %v1104_v59 = vadd.f32 %v405_v56, %v404_v32  ;;  %v1106_v60 = vadd.f32 %v410_v57, %v409_v53  ;;  %v1108_v61 = vadd.f32 %v415_v58, %v414_v52  ;;  %v1117_v5 = vadd.f32 %v450_v0, %v449_v3 }
  0x96   :  { %466 = vrot.lane.b32.xlu0 %v1104_v59, %s957_s1  ;;  %469 = vrot.lane.b32.xlu1 %v1106_v60, %s957_s1 }
  0x98   :  { %v394_v57 = vpop.permute.xlu0 %393 }
  0x99   :  { %v395_v63 = vsel %vm365_vm5, %v394_v57, 0.0 }
  0xc8   :  { %v385_v7 = vpop.permute.xlu2 %384 }
  0xc9   :  { %v386_v10 = vsel %vm365_vm5, %v385_v7, 0.0  ;;  %v1184_v7 = vadd.f32 %v1117_v5, %v395_v63 }
  0xca   :  { %v432_v12 = vmul.f32 %v386_v10, %v986_v2  ;;  %v437_v45 = vmul.f32 %v386_v10, %v995_v8  ;;  %v442_v53 = vmul.f32 0.0, %v386_v10 }
  0xd0   :  { %v388_v9 = vpop.permute.xlu2 %387 }
  0xd1   :  { %v389_v11 = vsel %vm365_vm5, %v388_v9, 0.0 }
  0xd2   :  { %v433_v13 = vmul.f32 %v389_v11, %v355_v38  ;;  %v443_v54 = vmul.f32 %v389_v11, %v1071_v4  ;;  %v460_v62 = vmul.f32 %v389_v11, %v1081_v42 }
  0xd4   :  { %v434_v15 = vadd.f32 %v433_v13, %v432_v12  ;;  %v444_v58 = vadd.f32 %v443_v54, %v442_v53 }
  0xd8   :  { %v391_v16 = vpop.permute.xlu2 %390 }
  0xd9   :  { %v392_v17 = vsel %vm365_vm5, %v391_v16, 1.0 }
  0xda   :  { %v435_v18 = vmul.f32 %v392_v17, %v1053_v36  ;;  %v440_v37 = vmul.f32 %v392_v17, %v1061_v1  ;;  %v462_v3 = vmul.f32 %v392_v17, %v1085_v43 }
  0xdc   :  { %v1127_v19 = vadd.f32 %v435_v18, %v434_v15 }
  0xde   :  { %484 = vrot.lane.b32.xlu1 %v1127_v19, %s957_s1 }
  0xe0   :  { %v376_v20 = vpop.permute.xlu1 %375  ;;  %v400_v12 = vpop.permute.xlu2 %399 }
  0xe1   :  { %v377_v22 = vsel %vm365_vm5, %v376_v20, 0.0 }
  0xe2   :  { %v417_v26 = vmul.f32 %v377_v22, %v986_v2  ;;  %v422_v27 = vmul.f32 %v377_v22, %v995_v8  ;;  %v427_v28 = vmul.f32 0.0, %v377_v22  ;;  %v438_v2 = vmul.f32 %v389_v11, %v1065_v39 }
  0xe8   :  { %v379_v6 = vpop.permute.xlu1 %378 }
  0xe9   :  { %v380_v21 = vsel %vm365_vm5, %v379_v6, 1.0 }
  0xea   :  { %v418_v23 = vmul.f32 %v380_v21, %v355_v38  ;;  %v423_v24 = vmul.f32 %v380_v21, %v1065_v39  ;;  %v428_v25 = vmul.f32 %v380_v21, %v1071_v4  ;;  %v454_v49 = vmul.f32 %v380_v21, %v1081_v42 }
  0xeb   :  { %v439_v39 = vadd.f32 %v438_v2, %v437_v45  ;;  %v445_v4 = vmul.f32 %v392_v17, %v1050_v35 }
  0xec   :  { %v419_v30 = vadd.f32 %v418_v23, %v417_v26  ;;  %v424_v31 = vadd.f32 %v423_v24, %v422_v27  ;;  %v429_v40 = vadd.f32 %v428_v25, %v427_v28 }
  0xed   :  { %v1165_v55 = vadd.f32 %v440_v37, %v439_v39  ;;  %v1180_v0 = vadd.f32 %v445_v4, %v444_v58 }
  0xf0   :  { %v382_v29 = vpop.permute.xlu1 %381 }
  0xf1   :  { %v383_v33 = vsel %vm365_vm5, %v382_v29, 0.0 }
  0xf2   :  { %v420_v41 = vmul.f32 %v383_v33, %v1053_v36  ;;  %v425_v38 = vmul.f32 %v383_v33, %v1061_v1  ;;  %v430_v44 = vmul.f32 %v383_v33, %v1050_v35  ;;  %v453_v36 = vmul.f32 %v377_v22, %v1028_v48 }
  0xf3   :  { %v456_v8 = vmul.f32 %v383_v33, %v1085_v43  ;;  %v459_v1 = vmul.f32 %v386_v10, %v1028_v48  ;;  %v401_v35 = vsel %vm365_vm5, %v400_v12, 0.0 }
  0xf4   :  { %v1146_v46 = vadd.f32 %v420_v41, %v419_v30  ;;  %v1148_v47 = vadd.f32 %v425_v38, %v424_v31  ;;  %v1150_v14 = vadd.f32 %v430_v44, %v429_v40  ;;  %v455_v51 = vadd.f32 %v454_v49, %v453_v36 }
  0xf5   :  { %v461_v9 = vadd.f32 %v460_v62, %v459_v1 }
  0xf6   :  { %475 = vrot.lane.b32.xlu2 %v1146_v46, %s957_s1  ;;  %478 = vrot.lane.b32.xlu0 %v1148_v47, %s957_s1  ;;  %v457_v32 = vadd.f32 %v456_v8, %v455_v51 }
  0xf7   :  { %481 = vrot.lane.b32.xlu1 %v1150_v14, %s957_s1  ;;  %v463_v48 = vadd.f32 %v462_v3, %v461_v9 }
  0xf8   :  { %v397_v50 = vpop.permute.xlu1 %396 }
  0xf9   :  { %v398_v52 = vsel %vm365_vm5, %v397_v50, 0.0  ;;  %v1192_v42 = vadd.f32 %v463_v48, %v401_v35 }
  0xfa   :  { %v1167_v56 = vadd.f32 %v457_v32, %v398_v52 }
  0xfe   :  { %487 = vrot.lane.b32.xlu2 %v1165_v55, %s957_s1  ;;  %472 = vrot.lane.b32.xlu0 %v1108_v61, %s957_s1 }
  0xff   :  { %496 = vrot.lane.b32.xlu1 %v1167_v56, %s957_s1 }
 0x106   :  { %490 = vrot.lane.b32.xlu2 %v1180_v0, %s957_s1  ;;  %493 = vrot.lane.b32.xlu0 %v1184_v7, %s957_s1 }
 0x108   :  { %v470_v5 = vpop.permute.xlu1 %469  ;;  %v467_v10 = vpop.permute.xlu0 %466 }
 0x109   :  { %v1203_v17 = vsel %vm465_vm6, %v467_v10, 1.0  ;;  %v1211_v6 = vsel %vm465_vm6, %v470_v5, 0.0 }
 0x10a   :  { %v502_v24 = vmul.f32 %v1203_v17, %v1104_v59  ;;  %v507_v28 = vmul.f32 %v1203_v17, %v1106_v60  ;;  %v503_v29 = vmul.f32 %v1211_v6, %v1146_v46  ;;  %v508_v30 = vmul.f32 %v1211_v6, %v1148_v47 }
 0x10b   :  { %v513_v48 = vmul.f32 %v1211_v6, %v1150_v14 }
 0x10c   :  { %v504_v45 = vadd.f32 %v503_v29, %v502_v24  ;;  %v509_v2 = vadd.f32 %v508_v30, %v507_v28  ;;  %v548_v24 = vmul.f32 %v1211_v6, %v1167_v56 }
 0x10e   :  { %499 = vrot.lane.b32.xlu2 %v1192_v42, %s957_s1 }
 0x150   :  { %v476_v43 = vpop.permute.xlu2 %475  ;;  %v485_v11 = vpop.permute.xlu1 %484 }
 0x151   :  { %v1199_v15 = vsel %vm465_vm6, %v476_v43, 0.0  ;;  %v486_v40 = vsel %vm465_vm6, %v485_v11, 0.0 }
 0x152   :  { %v517_v21 = vmul.f32 %v1199_v15, %v1104_v59  ;;  %v537_v36 = vmul.f32 %v486_v40, %v1106_v60  ;;  %v522_v53 = vmul.f32 %v1199_v15, %v1106_v60  ;;  %v532_v1 = vmul.f32 %v486_v40, %v1104_v59 }
 0x153   :  { %v542_v60 = vmul.f32 %v486_v40, %v1108_v61  ;;  %v527_v35 = vmul.f32 %v1199_v15, %v1108_v61  ;;  %v559_v5 = vmul.f32 %v486_v40, %v1184_v7 }
 0x158   :  { %v488_v13 = vpop.permute.xlu2 %487 }
 0x159   :  { %v489_v31 = vsel %vm465_vm6, %v488_v13, 0.0 }
 0x15a   :  { %v538_v38 = vmul.f32 %v489_v31, %v1148_v47  ;;  %v533_v54 = vmul.f32 %v489_v31, %v1146_v46  ;;  %v560_v43 = vmul.f32 %v489_v31, %v1167_v56 }
 0x15c   :  { %v539_v50 = vadd.f32 %v538_v38, %v537_v36 }
 0x160   :  { %v491_v25 = vpop.permute.xlu2 %490 }
 0x161   :  { %v492_v41 = vsel %vm465_vm6, %v491_v25, 1.0 }
 0x162   :  { %v540_v8 = vmul.f32 %v492_v41, %v1165_v55  ;;  %v535_v58 = vmul.f32 %v492_v41, %v1127_v19  ;;  %v545_v4 = vmul.f32 %v492_v41, %v1180_v0  ;;  %v562_v10 = vmul.f32 %v492_v41, %v1192_v42 }
 0x164   :  { %v1257_v57 = vadd.f32 %v540_v8, %v539_v50 }
 0x168   :  { %v479_v16 = vpop.permute.xlu0 %478  ;;  %v500_v13 = vpop.permute.xlu2 %499 }
 0x169   :  { %v1207_v18 = vsel %vm465_vm6, %v479_v16, 1.0  ;;  %v482_v20 = vpop.permute.xlu1 %481  ;;  %v501_v25 = vsel %vm465_vm6, %v500_v13, 0.0 }
 0x16a   :  { %v518_v22 = vmul.f32 %v1207_v18, %v1146_v46  ;;  %v1219_v23 = vsel %vm465_vm6, %v482_v20, 0.0  ;;  %v523_v51 = vmul.f32 %v1207_v18, %v1148_v47  ;;  %v543_v47 = vmul.f32 %v489_v31, %v1150_v14 }
 0x16b   :  { %v520_v27 = vmul.f32 %v1219_v23, %v1127_v19  ;;  %v534_v46 = vadd.f32 %v533_v54, %v532_v1  ;;  %v525_v63 = vmul.f32 %v1219_v23, %v1165_v55  ;;  %v528_v59 = vmul.f32 %v1207_v18, %v1150_v14 }
 0x16c   :  { %v519_v26 = vadd.f32 %v518_v22, %v517_v21  ;;  %v524_v62 = vadd.f32 %v523_v51, %v522_v53  ;;  %v544_v3 = vadd.f32 %v543_v47, %v542_v60  ;;  %v554_v16 = vmul.f32 %v1207_v18, %v1167_v56 }
 0x16d   :  { %v1272_v9 = vadd.f32 %v535_v58, %v534_v46  ;;  %v529_v11 = vadd.f32 %v528_v59, %v527_v35  ;;  %v530_v20 = vmul.f32 %v1219_v23, %v1180_v0  ;;  %v561_v21 = vadd.f32 %v560_v43, %v559_v5 }
 0x16e   :  { %v1233_v33 = vadd.f32 %v520_v27, %v519_v26  ;;  %v1276_v12 = vadd.f32 %v525_v63, %v524_v62  ;;  %v547_v22 = vmul.f32 %v1203_v17, %v1184_v7  ;;  %v553_v26 = vmul.f32 %v1199_v15, %v1184_v7 }
 0x16f   :  { %v1308_v27 = vadd.f32 %v530_v20, %v529_v11  ;;  %v563_v28 = vadd.f32 %v562_v10, %v561_v21  ;;  %v556_v56 = vmul.f32 %v1219_v23, %v1192_v42 }
 0x170   :  { %v473_v44 = vpop.permute.xlu0 %472  ;;  %575 = vrot.lane.b32.xlu2 %v1233_v33, %s958_s19  ;;  %v549_v7 = vadd.f32 %v548_v24, %v547_v22 }
 0x171   :  { %v474_v49 = vsel %vm465_vm6, %v473_v44, 0.0  ;;  %v1312_v29 = vadd.f32 %v563_v28, %v501_v25  ;;  %v497_v30 = vpop.permute.xlu1 %496 }
 0x172   :  { %v505_v39 = vmul.f32 %v474_v49, %v1127_v19  ;;  %v510_v37 = vmul.f32 %v474_v49, %v1165_v55  ;;  %v512_v19 = vmul.f32 %v1203_v17, %v1108_v61  ;;  %v1285_v55 = vadd.f32 %v545_v4, %v544_v3 }
 0x173   :  { %v515_v14 = vmul.f32 %v474_v49, %v1180_v0  ;;  %v550_v0 = vmul.f32 %v474_v49, %v1192_v42  ;;  %v555_v17 = vadd.f32 %v554_v16, %v553_v26  ;;  %v498_v15 = vsel %vm465_vm6, %v497_v30, 0.0 }
 0x174   :  { %v1250_v52 = vadd.f32 %v505_v39, %v504_v45  ;;  %v1252_v32 = vadd.f32 %v510_v37, %v509_v2  ;;  %v514_v61 = vadd.f32 %v513_v48, %v512_v19 }
 0x175   :  { %v557_v40 = vadd.f32 %v556_v56, %v555_v17  ;;  %v551_v41 = vadd.f32 %v550_v0, %v549_v7 }
 0x176   :  { %569 = vrot.lane.b32.xlu1 %v1252_v32, %s958_s19  ;;  %566 = vrot.lane.b32.xlu0 %v1250_v52, %s958_s19  ;;  %v1310_v18 = vadd.f32 %v515_v14, %v514_v61 }
 0x177   :  { %v1327_v38 = vadd.f32 %v557_v40, %v498_v15 }
 0x178   :  { %587 = vrot.lane.b32.xlu2 %v1257_v57, %s958_s19  ;;  %v494_v31 = vpop.permute.xlu0 %493 }
 0x179   :  { %v495_v6 = vsel %vm465_vm6, %v494_v31, 0.0 }
 0x17a   :  { %v1329_v44 = vadd.f32 %v551_v41, %v495_v6 }
 0x17e   :  { %584 = vrot.lane.b32.xlu1 %v1272_v9, %s958_s19  ;;  %578 = vrot.lane.b32.xlu0 %v1276_v12, %s958_s19 }
 0x180   :  { %590 = vrot.lane.b32.xlu2 %v1285_v55, %s958_s19 }
 0x186   :  { %581 = vrot.lane.b32.xlu1 %v1308_v27, %s958_s19  ;;  %572 = vrot.lane.b32.xlu0 %v1310_v18, %s958_s19 }
 0x188   :  { %599 = vrot.lane.b32.xlu2 %v1312_v29, %s958_s19 }
 0x18e   :  { %596 = vrot.lane.b32.xlu1 %v1327_v38, %s958_s19  ;;  %593 = vrot.lane.b32.xlu0 %v1329_v44, %s958_s19 }
 0x1ca   :  { %v576_v42 = vpop.permute.xlu2 %575 }
 0x1cb   :  { %v1348_v50 = vsel %vm565_vm7, %v576_v42, 0.0 }
 0x1cc   :  { %v617_v58 = vmul.f32 %v1348_v50, %v1250_v52  ;;  %v622_v25 = vmul.f32 %v1348_v50, %v1252_v32  ;;  %v627_v40 = vmul.f32 %v1348_v50, %v1310_v18 }
 0x1d2   :  { %v588_v36 = vpop.permute.xlu2 %587 }
 0x1d3   :  { %v589_v3 = vsel %vm565_vm7, %v588_v36, 0.0 }
 0x1d4   :  { %v638_v20 = vmul.f32 %v589_v3, %v1276_v12  ;;  %v633_v21 = vmul.f32 %v589_v3, %v1233_v33  ;;  %v643_v7 = vmul.f32 %v589_v3, %v1308_v27 }
 0x1da   :  { %v591_v10 = vpop.permute.xlu2 %590 }
 0x1db   :  { %v592_v22 = vsel %vm565_vm7, %v591_v10, 1.0 }
 0x1dc   :  { %v635_v0 = vmul.f32 %v592_v22, %v1272_v9 }
 0x1e8   :  { %v570_v23 = vpop.permute.xlu1 %569  ;;  %v567_v45 = vpop.permute.xlu0 %566 }
 0x1e9   :  { %v571_v39 = vsel %vm565_vm7, %v570_v23, 0.0  ;;  %v1344_v37 = vsel %vm565_vm7, %v567_v45, 1.0  ;;  %v660_v23 = vmul.f32 %v589_v3, %v1327_v38 }
 0x1ea   :  { %v603_v53 = vmul.f32 %v571_v39, %v1233_v33  ;;  %v608_v54 = vmul.f32 %v571_v39, %v1276_v12  ;;  %v602_v1 = vmul.f32 %v1344_v37, %v1250_v52  ;;  %v607_v47 = vmul.f32 %v1344_v37, %v1252_v32 }
 0x1ec   :  { %v604_v48 = vadd.f32 %v603_v53, %v602_v1  ;;  %v609_v35 = vadd.f32 %v608_v54, %v607_v47  ;;  %v647_v53 = vmul.f32 %v1344_v37, %v1329_v44  ;;  %v662_v47 = vmul.f32 %v592_v22, %v1312_v29 }
 0x1f0   :  { %v585_v2 = vpop.permute.xlu1 %584  ;;  %v579_v49 = vpop.permute.xlu0 %578 }
 0x1f1   :  { %v1338_v8 = vsel %vm565_vm7, %v579_v49, 1.0  ;;  %v586_v46 = vsel %vm565_vm7, %v585_v2, 0.0  ;;  %v648_v49 = vmul.f32 %v571_v39, %v1327_v38 }
 0x1f2   :  { %v618_v51 = vmul.f32 %v1338_v8, %v1233_v33  ;;  %v637_v11 = vmul.f32 %v586_v46, %v1252_v32  ;;  %v632_v14 = vmul.f32 %v586_v46, %v1250_v52  ;;  %v623_v24 = vmul.f32 %v1338_v8, %v1276_v12 }
 0x1f3   :  { %v640_v33 = vmul.f32 %v592_v22, %v1257_v57  ;;  %v642_v12 = vmul.f32 %v586_v46, %v1310_v18  ;;  %v613_v32 = vmul.f32 %v571_v39, %v1308_v27  ;;  %v659_v6 = vmul.f32 %v586_v46, %v1329_v44 }
 0x1f4   :  { %v619_v59 = vadd.f32 %v618_v51, %v617_v58  ;;  %v639_v52 = vadd.f32 %v638_v20, %v637_v11  ;;  %v634_v26 = vadd.f32 %v633_v21, %v632_v14  ;;  %v624_v30 = vadd.f32 %v623_v24, %v622_v25 }
 0x1f5   :  { %v644_v15 = vadd.f32 %v643_v7, %v642_v12  ;;  %v661_v36 = vadd.f32 %v660_v23, %v659_v6  ;;  %v649_v46 = vadd.f32 %v648_v49, %v647_v53 }
 0x1f6   :  { %v1397_v17 = vadd.f32 %v640_v33, %v639_v52  ;;  %v1401_v56 = vadd.f32 %v635_v0, %v634_v26 }
 0x1f8   :  { %v582_v62 = vpop.permute.xlu1 %581  ;;  %v573_v60 = vpop.permute.xlu0 %572 }
 0x1f9   :  { %v583_v4 = vsel %vm565_vm7, %v582_v62, 0.0  ;;  %v574_v63 = vsel %vm565_vm7, %v573_v60, 0.0 }
 0x1fa   :  { %v620_v19 = vmul.f32 %v583_v4, %v1272_v9  ;;  %v605_v43 = vmul.f32 %v574_v63, %v1272_v9  ;;  %v610_v5 = vmul.f32 %v574_v63, %v1257_v57  ;;  %v625_v28 = vmul.f32 %v583_v4, %v1257_v57 }
 0x1fb   :  { %v612_v57 = vmul.f32 %v1344_v37, %v1310_v18  ;;  %v628_v9 = vmul.f32 %v1338_v8, %v1308_v27  ;;  %v630_v41 = vmul.f32 %v583_v4, %v1285_v55  ;;  %v615_v42 = vmul.f32 %v574_v63, %v1285_v55 }
 0x1fc   :  { %v1372_v13 = vadd.f32 %v620_v19, %v619_v59  ;;  %v1375_v61 = vadd.f32 %v605_v43, %v604_v48  ;;  %v1377_v16 = vadd.f32 %v610_v5, %v609_v35  ;;  %v1399_v31 = vadd.f32 %v625_v28, %v624_v30 }
 0x1fd   :  { %v645_v27 = vmul.f32 %v592_v22, %v1285_v55  ;;  %v614_v45 = vadd.f32 %v613_v32, %v612_v57  ;;  %v629_v2 = vadd.f32 %v628_v9, %v627_v40  ;;  %v654_v18 = vmul.f32 %v1338_v8, %v1327_v38  ;;  %v600_v38 = vpop.permute.xlu2 %599 }
 0x1fe   :  { %675 = vrot.lane.b32.xlu2 %v1372_v13, %s959_s20  ;;  %669 = vrot.lane.b32.xlu1 %v1377_v16, %s959_s20  ;;  %v653_v55 = vmul.f32 %v1348_v50, %v1329_v44  ;;  %v656_v39 = vmul.f32 %v583_v4, %v1312_v29  ;;  %v650_v58 = vmul.f32 %v574_v63, %v1312_v29  ;;  %v601_v29 = vsel %vm565_vm7, %v600_v38, 0.0 }
 0x1ff   :  { %666 = vrot.lane.b32.xlu0 %v1375_v61, %s959_s20  ;;  %v1423_v51 = vadd.f32 %v645_v27, %v644_v15  ;;  %v1429_v54 = vadd.f32 %v630_v41, %v629_v2  ;;  %v1431_v1 = vadd.f32 %v615_v42, %v614_v45  ;;  %v663_v8 = vadd.f32 %v662_v47, %v661_v36 }
 0x200   :  { %v597_v37 = vpop.permute.xlu1 %596  ;;  %v594_v62 = vpop.permute.xlu0 %593  ;;  %v655_v60 = vadd.f32 %v654_v18, %v653_v55  ;;  %v651_v4 = vadd.f32 %v650_v58, %v649_v46 }
 0x201   :  { %v598_v3 = vsel %vm565_vm7, %v597_v37, 0.0  ;;  %v595_v44 = vsel %vm565_vm7, %v594_v62, 0.0  ;;  %v1450_v63 = vadd.f32 %v663_v8, %v601_v29 }
 0x202   :  { %v657_v50 = vadd.f32 %v656_v39, %v655_v60  ;;  %v1454_v19 = vadd.f32 %v651_v4, %v595_v44 }
 0x204   :  { %v1452_v59 = vadd.f32 %v657_v50, %v598_v3 }
 0x206   :  { %687 = vrot.lane.b32.xlu2 %v1397_v17, %s959_s20  ;;  %684 = vrot.lane.b32.xlu1 %v1401_v56, %s959_s20 }
 0x207   :  { %678 = vrot.lane.b32.xlu0 %v1399_v31, %s959_s20 }
 0x20e   :  { %690 = vrot.lane.b32.xlu2 %v1423_v51, %s959_s20  ;;  %681 = vrot.lane.b32.xlu1 %v1429_v54, %s959_s20 }
 0x20f   :  { %672 = vrot.lane.b32.xlu0 %v1431_v1, %s959_s20 }
 0x216   :  { %699 = vrot.lane.b32.xlu2 %v1450_v63, %s959_s20  ;;  %696 = vrot.lane.b32.xlu1 %v1452_v59, %s959_s20 }
 0x217   :  { %693 = vrot.lane.b32.xlu0 %v1454_v19, %s959_s20 }
 0x258   :  { %v676_v48 = vpop.permute.xlu2 %675 }
 0x259   :  { %v1475_v22 = vsel %vm665_vm8, %v676_v48, 0.0 }
 0x25a   :  { %v717_v33 = vmul.f32 %v1475_v22, %v1375_v61  ;;  %v722_v48 = vmul.f32 %v1475_v22, %v1377_v16 }
 0x260   :  { %v688_v11 = vpop.permute.xlu2 %687 }
 0x261   :  { %v689_v57 = vsel %vm665_vm8, %v688_v11, 0.0 }
 0x262   :  { %v738_v53 = vmul.f32 %v689_v57, %v1399_v31  ;;  %v733_v18 = vmul.f32 %v689_v57, %v1372_v13  ;;  %v743_v44 = vmul.f32 %v689_v57, %v1429_v54 }
 0x268   :  { %v691_v23 = vpop.permute.xlu2 %690 }
 0x269   :  { %v692_v47 = vsel %vm665_vm8, %v691_v23, 1.0 }
 0x26a   :  { %v740_v62 = vmul.f32 %v692_v47, %v1397_v17 }
 0x270   :  { %v670_v35 = vpop.permute.xlu1 %669 }
 0x271   :  { %v667_v43 = vpop.permute.xlu0 %666  ;;  %v671_v20 = vsel %vm665_vm8, %v670_v35, 0.0  ;;  %v727_v35 = vmul.f32 %v1475_v22, %v1431_v1 }
 0x272   :  { %v1471_v21 = vsel %vm665_vm8, %v667_v43, 1.0  ;;  %v703_v52 = vmul.f32 %v671_v20, %v1372_v13  ;;  %v708_v25 = vmul.f32 %v671_v20, %v1399_v31  ;;  %v713_v55 = vmul.f32 %v671_v20, %v1429_v54 }
 0x273   :  { %v702_v26 = vmul.f32 %v1471_v21, %v1375_v61  ;;  %v707_v28 = vmul.f32 %v1471_v21, %v1377_v16  ;;  %v712_v39 = vmul.f32 %v1471_v21, %v1431_v1 }
 0x275   :  { %v709_v41 = vadd.f32 %v708_v25, %v707_v28  ;;  %v704_v42 = vadd.f32 %v703_v52, %v702_v26  ;;  %v714_v38 = vadd.f32 %v713_v55, %v712_v39  ;;  %v762_v28 = vmul.f32 %v692_v47, %v1450_v63 }
 0x278   :  { %v685_v5 = vpop.permute.xlu1 %684 }
 0x279   :  { %v679_v10 = vpop.permute.xlu0 %678  ;;  %v686_v12 = vsel %vm665_vm8, %v685_v5, 0.0  ;;  %v760_v5 = vmul.f32 %v689_v57, %v1452_v59 }
 0x27a   :  { %v1465_v14 = vsel %vm665_vm8, %v679_v10, 1.0  ;;  %v737_v27 = vmul.f32 %v686_v12, %v1377_v16  ;;  %v732_v2 = vmul.f32 %v686_v12, %v1375_v61  ;;  %v742_v8 = vmul.f32 %v686_v12, %v1431_v1 }
 0x27b   :  { %v718_v24 = vmul.f32 %v1465_v14, %v1372_v13  ;;  %v735_v13 = vmul.f32 %v692_v47, %v1401_v56  ;;  %v723_v29 = vmul.f32 %v1465_v14, %v1399_v31  ;;  %v728_v50 = vmul.f32 %v1465_v14, %v1429_v54 }
 0x27c   :  { %v739_v61 = vadd.f32 %v738_v53, %v737_v27  ;;  %v734_v37 = vadd.f32 %v733_v18, %v732_v2  ;;  %v744_v4 = vadd.f32 %v743_v44, %v742_v8  ;;  %v745_v54 = vmul.f32 %v692_v47, %v1423_v51 }
 0x27d   :  { %v719_v15 = vadd.f32 %v718_v24, %v717_v33  ;;  %v729_v10 = vadd.f32 %v728_v50, %v727_v35  ;;  %v724_v11 = vadd.f32 %v723_v29, %v722_v48  ;;  %v748_v24 = vmul.f32 %v671_v20, %v1452_v59 }
 0x27e   :  { %v741_v60 = vadd.f32 %v740_v62, %v739_v61  ;;  %v736_v46 = vadd.f32 %v735_v13, %v734_v37  ;;  %v746_v25 = vadd.f32 %v745_v54, %v744_v4  ;;  %v747_v16 = vmul.f32 %v1471_v21, %v1454_v19 }
 0x27f   :  { %v754_v1 = vmul.f32 %v1465_v14, %v1452_v59  ;;  %v700_v59 = vpop.permute.xlu2 %699 }
 0x280   :  { %v682_v0 = vpop.permute.xlu1 %681 }
 0x281   :  { %v673_v30 = vpop.permute.xlu0 %672  ;;  %v683_v7 = vsel %vm665_vm8, %v682_v0, 0.0 }
 0x282   :  { %v674_v32 = vsel %vm665_vm8, %v673_v30, 0.0  ;;  %v720_v9 = vmul.f32 %v683_v7, %v1401_v56  ;;  %v725_v43 = vmul.f32 %v683_v7, %v1397_v17  ;;  %v730_v31 = vmul.f32 %v683_v7, %v1423_v51 }
 0x283   :  { %v705_v6 = vmul.f32 %v674_v32, %v1401_v56  ;;  %v710_v40 = vmul.f32 %v674_v32, %v1397_v17  ;;  %v715_v58 = vmul.f32 %v674_v32, %v1423_v51  ;;  %v759_v56 = vmul.f32 %v686_v12, %v1454_v19 }
 0x284   :  { %v721_v45 = vadd.f32 %v720_v9, %v719_v15  ;;  %v731_v26 = vadd.f32 %v730_v31, %v729_v10  ;;  %v726_v17 = vadd.f32 %v725_v43, %v724_v11  ;;  %v753_v51 = vmul.f32 %v1475_v22, %v1454_v19 }
 0x285   :  { %v711_v49 = vadd.f32 %v710_v40, %v709_v41  ;;  %v706_v36 = vadd.f32 %v705_v6, %v704_v42  ;;  %v716_v3 = vadd.f32 %v715_v58, %v714_v38  ;;  %v761_v52 = vadd.f32 %v760_v5, %v759_v56 }
 0x286   :  { %775 = vrot.lane.b32.xlu2 %v721_v45, %s960_s21  ;;  %v756_v33 = vmul.f32 %v683_v7, %v1450_v63  ;;  %v750_v20 = vmul.f32 %v674_v32, %v1450_v63  ;;  %v755_v21 = vadd.f32 %v754_v1, %v753_v51  ;;  %v749_v12 = vadd.f32 %v748_v24, %v747_v16 }
 0x287   :  { %769 = vrot.lane.b32.xlu1 %v711_v49, %s960_s21  ;;  %766 = vrot.lane.b32.xlu0 %v706_v36, %s960_s21  ;;  %v763_v14 = vadd.f32 %v762_v28, %v761_v52  ;;  %v701_v22 = vsel %vm665_vm8, %v700_v59, 0.0 }
 0x288   :  { %v697_v0 = vpop.permute.xlu1 %696  ;;  %v757_v63 = vadd.f32 %v756_v33, %v755_v21  ;;  %v751_v7 = vadd.f32 %v750_v20, %v749_v12 }
 0x289   :  { %v694_v30 = vpop.permute.xlu0 %693  ;;  %v698_v57 = vsel %vm665_vm8, %v697_v0, 0.0  ;;  %v764_v32 = vadd.f32 %v763_v14, %v701_v22 }
 0x28a   :  { %v695_v19 = vsel %vm665_vm8, %v694_v30, 0.0  ;;  %v758_v9 = vadd.f32 %v757_v63, %v698_v57 }
 0x28b   :  { %v752_v15 = vadd.f32 %v751_v7, %v695_v19 }
 0x28e   :  { %787 = vrot.lane.b32.xlu2 %v741_v60, %s960_s21 }
 0x28f   :  { %784 = vrot.lane.b32.xlu1 %v736_v46, %s960_s21  ;;  %772 = vrot.lane.b32.xlu0 %v716_v3, %s960_s21 }
 0x296   :  { %790 = vrot.lane.b32.xlu2 %v746_v25, %s960_s21 }
 0x297   :  { %781 = vrot.lane.b32.xlu1 %v731_v26, %s960_s21  ;;  %778 = vrot.lane.b32.xlu0 %v726_v17, %s960_s21 }
 0x29e   :  { %799 = vrot.lane.b32.xlu2 %v764_v32, %s960_s21 }
 0x29f   :  { %796 = vrot.lane.b32.xlu1 %v758_v9, %s960_s21  ;;  %793 = vrot.lane.b32.xlu0 %v752_v15, %s960_s21 }
 0x2e0   :  { %v776_v6 = vpop.permute.xlu2 %775 }
 0x2e1   :  { %v777_v58 = vsel %vm765_vm9, %v776_v6, 0.0 }
 0x2e2   :  { %v808_v44 = vmul.f32 %v777_v58, %v752_v15 }
 0x2e8   :  { %v788_v40 = vpop.permute.xlu2 %787 }
 0x2e9   :  { %v789_v27 = vsel %vm765_vm9, %v788_v40, 0.0 }
 0x2ea   :  { %v815_v53 = vmul.f32 %v789_v27, %v758_v9 }
 0x2f0   :  { %v791_v23 = vpop.permute.xlu2 %790 }
 0x2f1   :  { %v792_v49 = vsel %vm765_vm9, %v791_v23, 1.0 }
 0x2f2   :  { %v817_v47 = vmul.f32 %v792_v49, %v764_v32 }
 0x2f8   :  { %v800_v55 = vpop.permute.xlu2 %799 }
 0x2f9   :  { %v770_v41 = vpop.permute.xlu1 %769  ;;  %v767_v42 = vpop.permute.xlu0 %766  ;;  %v801_v13 = vsel %vm765_vm9, %v800_v55, 0.0 }
 0x2fa   :  { %v771_v37 = vsel %vm765_vm9, %v770_v41, 0.0  ;;  %v768_v62 = vsel %vm765_vm9, %v767_v42, 1.0 }
 0x2fb   :  { %v803_v29 = vmul.f32 %v771_v37, %v758_v9  ;;  %v802_v50 = vmul.f32 %v768_v62, %v752_v15 }
 0x2fd   :  { %v804_v43 = vadd.f32 %v803_v29, %v802_v50 }
 0x301   :  { %v785_v45 = vpop.permute.xlu1 %784  ;;  %v773_v2 = vpop.permute.xlu0 %772 }
 0x302   :  { %v786_v36 = vsel %vm765_vm9, %v785_v45, 0.0  ;;  %v774_v46 = vsel %vm765_vm9, %v773_v2, 0.0 }
 0x303   :  { %v814_v18 = vmul.f32 %v786_v36, %v752_v15  ;;  %v805_v48 = vmul.f32 %v774_v46, %v764_v32 }
 0x305   :  { %v816_v39 = vadd.f32 %v815_v53, %v814_v18  ;;  %v806_v11 = vadd.f32 %v805_v48, %v804_v43 }
 0x307   :  { %v818_v61 = vadd.f32 %v817_v47, %v816_v39 }
 0x309   :  { %v819_v38 = vadd.f32 %v818_v61, %v801_v13  ;;  %v782_v8 = vpop.permute.xlu1 %781  ;;  %v779_v60 = vpop.permute.xlu0 %778 }
 0x30a   :  { %v780_v3 = vsel %vm765_vm9, %v779_v60, 1.0  ;;  %v783_v4 = vsel %vm765_vm9, %v782_v8, 0.0 }
 0x30b   :  { %824 = vst [vmem:[#allocation7 + $0x10] sm:$0xff] %v819_v38  ;;  %v809_v56 = vmul.f32 %v780_v3, %v758_v9  ;;  %v811_v31 = vmul.f32 %v783_v4, %v764_v32 }
 0x30d   :  { %v810_v35 = vadd.f32 %v809_v56, %v808_v44 }
 0x30f   :  { %v812_v54 = vadd.f32 %v811_v31, %v810_v35 }
 0x311   :  { %v797_v5 = vpop.permute.xlu1 %796  ;;  %v794_v10 = vpop.permute.xlu0 %793 }
 0x312   :  { %v798_v24 = vsel %vm765_vm9, %v797_v5, 0.0  ;;  %v795_v52 = vsel %vm765_vm9, %v794_v10, 0.0 }
 0x313   :  { %v813_v25 = vadd.f32 %v812_v54, %v798_v24  ;;  %v807_v16 = vadd.f32 %v806_v11, %v795_v52 }
 0x315   :  { %822 = vst [vmem:[#allocation7 + $0x8] sm:$0xff] %v813_v25 }
 0x316   :  { %820 = vst [vmem:[#allocation7] sm:$0xff] %v807_v16 }
 0x317   :  { %837 = dma.vmem_to_hbm [thread:$0]  %s830_s23, 384, %s832_s26, [#allocation4], %s962_s27, %s962_s27, %s959_s20  }
 0x318   :  { %944 = dma.done.wait [#allocation4], 384  }
 0x319   :  { %945 = vsyncadd [#allocation4], 4294966912 }
 0x31a   :  { %842 = vsyncpa [#allocation3], 1 }
 0x31b   :  { %843 = vsyncpa [#allocation6], 1 }
 0x31c   :  { %844 = vsyncpa [#allocation4], 1 }

</bundles_post_ra>
